<compile_context>
chip_gen: v7x
topology: tpu7x:2x2x1
jax: 0.10.0
libtpu: 0.0.40
codegen_flags: <defaults>
</compile_context>

<pallas_src>
import jax
import jax.numpy as jnp
from jax.experimental import pallas as pl
from jax.experimental.pallas import tpu as pltpu

NEG_SLOPE = 0.01   # nn.LeakyReLU default
HIDDEN = 1024
OUT_PAD = 128      # fc3 output padded to a full lane width (real width = 2)
N_TILE = 256       # fc2 output-chunk width streamed along grid axis 1


def _leaky_relu(h):
    return jnp.where(h > 0, h, NEG_SLOPE * h)


def _round_up(a, m):
    return (a + m - 1) // m * m


def _single_buffer_kwargs():
    """Single-buffer kwargs for resident (constant index_map) blocks.

    Falls back to default double-buffering if pipeline_mode / pl.Buffered is
    unavailable in the installed JAX version.
    """
    try:
        pl.BlockSpec((8, 128), lambda i, j: (0, 0), pipeline_mode=pl.Buffered(1))
        return dict(pipeline_mode=pl.Buffered(1))
    except Exception:
        return {}


_RESIDENT = _single_buffer_kwargs()


def _mlp_kernel(t_ref, x_ref, vecs_ref, w2_ref, b2_ref, w3_ref, b3_ref,
                out_ref, h_ref, acc_ref):
    j = pl.program_id(1)

    # fc1 (VPU) once per batch tile: fold t into the bias, then two broadcast
    # FMAs for the K=2 x-contraction.  Cached as bf16 in VMEM scratch and
    # reused by every fc2 N-chunk.
    @pl.when(j == 0)
    def _():
        t = t_ref[0]                         # f32 scalar (SMEM)
        w1t = vecs_ref[0:1, :]               # (1, H)
        w1x0 = vecs_ref[1:2, :]
        w1x1 = vecs_ref[2:3, :]
        b1 = vecs_ref[3:4, :]
        x = x_ref[...]                       # (bt, 2) f32
        h = x[:, 0:1] * w1x0 + x[:, 1:2] * w1x1 + (b1 + t * w1t)
        h_ref[...] = _leaky_relu(h).astype(h_ref.dtype)
        acc_ref[...] = jnp.zeros_like(acc_ref)

    # fc2 chunk: bf16 x bf16 -> f32 on the MXU, epilogue on the VPU, then the
    # fc3 partial product accumulates into the resident f32 accumulator.
    h2 = jnp.dot(h_ref[...], w2_ref[...], preferred_element_type=jnp.float32)
    h2 = _leaky_relu(h2 + b2_ref[...])
    acc_ref[...] += jnp.dot(h2.astype(jnp.bfloat16), w3_ref[...],
                            preferred_element_type=jnp.float32)

    @pl.when(j == pl.num_programs(1) - 1)
    def _():
        out_ref[...] = acc_ref[...] + b3_ref[...]


def diffusion_denoiser_forward(x, t, params):
    """x: (B, 2) f32, t: scalar / (1,) / (1,1) f32  ->  (B, 2) f32."""
    w1, b1, w2, b2, w3, b3 = params
    B = x.shape[0]
    H = w1.shape[1]
    n_out = w3.shape[1]

    # Batch tiling: multiples of 16 (bf16 sublane tile), capped at 512; for
    # B > 16 force at least two tiles so a v7x megacore engages both TCs.
    if B <= 16:
        bt = _round_up(max(B, 1), 16)
    else:
        bt = min(512, _round_up((B + 1) // 2, 16))
    bp = _round_up(max(B, 1), bt)

    x_p = x.astype(jnp.float32)
    if bp != B:
        x_p = jnp.pad(x_p, ((0, bp - B), (0, 0)))

    # Pack the fc1 per-feature vectors (t-row, x0-row, x1-row of W1, and b1)
    # into a single resident (8, H) operand: one DMA instead of four.
    vecs = jnp.zeros((8, H), jnp.float32)
    vecs = vecs.at[0, :].set(w1[0, :].astype(jnp.float32))
    vecs = vecs.at[1, :].set(w1[1, :].astype(jnp.float32))
    vecs = vecs.at[2, :].set(w1[2, :].astype(jnp.float32))
    vecs = vecs.at[3, :].set(b1.reshape(H).astype(jnp.float32))

    b2_r = b2.reshape(1, H).astype(jnp.float32)

    # Big weights in bf16 (kernel is weight-DMA bound in the small-batch regime).
    w2_bf = w2.astype(jnp.bfloat16)                                   # (H, H)
    w3_p = jnp.zeros((H, OUT_PAD), jnp.bfloat16).at[:, :n_out].set(
        w3.astype(jnp.bfloat16))
    b3_p = jnp.zeros((1, OUT_PAD), jnp.float32).at[:, :n_out].set(
        b3.reshape(1, n_out).astype(jnp.float32))

    t_s = jnp.asarray(t, jnp.float32).reshape(1)                      # SMEM scalar

    tn = N_TILE if H % N_TILE == 0 else H
    grid = (bp // bt, H // tn)

    flops = 2 * bp * H * (3 + H + OUT_PAD)
    bytes_accessed = (x_p.size * 4 + bp * OUT_PAD * 4 + w2_bf.size * 2 +
                      w3_p.size * 2 + vecs.size * 4 + b2_r.size * 4 +
                      b3_p.size * 4)

    out = pl.pallas_call(
        _mlp_kernel,
        out_shape=jax.ShapeDtypeStruct((bp, OUT_PAD), jnp.float32),
        grid_spec=pltpu.PrefetchScalarGridSpec(
            num_scalar_prefetch=0,
            grid=grid,
            in_specs=[
                pl.BlockSpec(memory_space=pltpu.MemorySpace.SMEM),      # t
                pl.BlockSpec((bt, 2), lambda i, j: (i, 0)),             # x tile
                pl.BlockSpec((8, H), lambda i, j: (0, 0), **_RESIDENT),  # fc1 vecs
                pl.BlockSpec((H, tn), lambda i, j: (0, j)),             # W2 N-chunk
                pl.BlockSpec((1, tn), lambda i, j: (0, j)),             # b2 chunk
                pl.BlockSpec((tn, OUT_PAD), lambda i, j: (j, 0)),       # W3 K-chunk
                pl.BlockSpec((1, OUT_PAD), lambda i, j: (0, 0), **_RESIDENT),  # b3
            ],
            out_specs=pl.BlockSpec((bt, OUT_PAD), lambda i, j: (i, 0)),
            scratch_shapes=[
                pltpu.VMEM((bt, H), jnp.bfloat16),       # fc1 activations
                pltpu.VMEM((bt, OUT_PAD), jnp.float32),  # fc3 accumulator
            ],
        ),
        compiler_params=pltpu.CompilerParams(
            dimension_semantics=("parallel", "arbitrary"),
            vmem_limit_bytes=32 << 20,
        ),
        cost_estimate=pl.CostEstimate(
            flops=flops, transcendentals=0, bytes_accessed=bytes_accessed),
    )(t_s, x_p, vecs, w2_bf, b2_r, w3_p, b3_p)

    return out[:B, :n_out]


def init_params(key):
    """Deterministic init matching the PyTorch module's shapes.

    fc1: Linear(3, 1024), fc2: Linear(1024, 1024), fc3: Linear(1024, 2).
    Weights are returned transposed to (in, out); biases as (1, out), all f32.
    """
    def linear(key, fan_in, fan_out):
        kw, kb = jax.random.split(key)
        bound = 1.0 / jnp.sqrt(fan_in)  # PyTorch default uniform init bound
        w = jax.random.uniform(kw, (fan_in, fan_out), jnp.float32, -bound, bound)
        b = jax.random.uniform(kb, (1, fan_out), jnp.float32, -bound, bound)
        return w, b

    k1, k2, k3 = jax.random.split(key, 3)
    w1, b1 = linear(k1, 3, HIDDEN)
    w2, b2 = linear(k2, HIDDEN, HIDDEN)
    w3, b3 = linear(k3, HIDDEN, 2)
    return (w1, b1, w2, b2, w3, b3)


def reference_forward(x, t, params):
    """Pure-JAX f32 reference for correctness checking."""
    B = x.shape[0]
    t_rep = jnp.broadcast_to(jnp.asarray(t, jnp.float32).reshape(1, 1), (B, 1))
    h = jnp.concatenate([t_rep, x.astype(jnp.float32)], axis=1)
    w1, b1, w2, b2, w3, b3 = params
    h = jax.nn.leaky_relu(h @ w1 + b1, NEG_SLOPE)
    h = jax.nn.leaky_relu(h @ w2 + b2, NEG_SLOPE)
    return h @ w3 + b3


if __name__ == "__main__":
    key = jax.random.PRNGKey(0)
    kp, kx, kt = jax.random.split(key, 3)

    params = init_params(kp)
    t = jax.random.uniform(kt, (1, 1), jnp.float32)   # timestep, as in torch

    fwd = jax.jit(diffusion_denoiser_forward)

    # Small batch (single batch tile) and a batch that exercises batch tiling,
    # padding and the megacore-friendly 2-tile split (B=300 -> bt=160, grid=(2,4)).
    for B in (4, 300):
        xb = jax.random.normal(jax.random.fold_in(kx, B), (B, 2), jnp.float32)
        out = jax.block_until_ready(fwd(xb, t, params))
        ref = reference_forward(xb, t, params)
        assert out.shape == (B, 2), out.shape
        err = float(jnp.max(jnp.abs(out - ref)))
        # bf16 weights + bf16 MXU LHS change numerics slightly vs f32 reference.
        assert err < 2e-2, f"B={B}: max abs err {err}"

    print("KERNEL_OK")
</pallas_src>

<mosaic_0001>
module attributes {stable_mosaic.version = 11 : i64} {
  func.func @_mlp_kernel(%arg0: i32, %arg1: i32, %arg2: memref<1xf32, #tpu.memory_space<smem>>, %arg3: memref<16x2xf32, #tpu.memory_space<vmem>>, %arg4: memref<8x1024xf32, #tpu.memory_space<vmem>>, %arg5: memref<1024x256xbf16, #tpu.memory_space<vmem>>, %arg6: memref<1x256xf32, #tpu.memory_space<vmem>>, %arg7: memref<256x128xbf16, #tpu.memory_space<vmem>>, %arg8: memref<1x128xf32, #tpu.memory_space<vmem>>, %arg9: memref<16x128xf32, #tpu.memory_space<vmem>>, %arg10: memref<16x1024xbf16, #tpu.memory_space<vmem>>, %arg11: memref<16x128xf32, #tpu.memory_space<vmem>>) attributes {dimension_semantics = [#tpu.dimension_semantics<parallel>, #tpu.dimension_semantics<arbitrary>], iteration_bounds = array<i64: 1, 4>, scalar_prefetch = 0 : i64, scratch_operands = 2 : i64, tpu.core_type = #tpu.core_type<tc>, window_params = [{transform_indices = @transform_0, window_bounds = array<i64: 1>}, {transform_indices = @transform_1, window_bounds = array<i64: 16, 2>}, {pipeline_mode = #tpu.pipeline_mode<synchronous>, transform_indices = @transform_2, window_bounds = array<i64: 8, 1024>}, {transform_indices = @transform_3, window_bounds = array<i64: 1024, 256>}, {transform_indices = @transform_4, window_bounds = array<i64: 1, 256>}, {transform_indices = @transform_5, window_bounds = array<i64: 256, 128>}, {pipeline_mode = #tpu.pipeline_mode<synchronous>, transform_indices = @transform_6, window_bounds = array<i64: 1, 128>}, {transform_indices = @transform_7, window_bounds = array<i64: 16, 128>}]} {
    %c0_i32 = arith.constant 0 : i32
    %0 = arith.cmpi eq, %arg1, %c0_i32 : i32
    %1 = arith.extui %0 : i1 to i32
    %c0_i32_0 = arith.constant 0 : i32
    %2 = arith.cmpi ne, %1, %c0_i32_0 : i32
    scf.if %2 {
      %c0_16 = arith.constant 0 : index
      %23 = memref.load %arg2[%c0_16] : memref<1xf32, #tpu.memory_space<smem>>
      %c0_17 = arith.constant 0 : index
      %c0_18 = arith.constant 0 : index
      %24 = vector.load %arg4[%c0_17, %c0_18] : memref<8x1024xf32, #tpu.memory_space<vmem>>, vector<1x1024xf32>
      %c1 = arith.constant 1 : index
      %c0_19 = arith.constant 0 : index
      %25 = vector.load %arg4[%c1, %c0_19] : memref<8x1024xf32, #tpu.memory_space<vmem>>, vector<1x1024xf32>
      %c2 = arith.constant 2 : index
      %c0_20 = arith.constant 0 : index
      %26 = vector.load %arg4[%c2, %c0_20] : memref<8x1024xf32, #tpu.memory_space<vmem>>, vector<1x1024xf32>
      %c3 = arith.constant 3 : index
      %c0_21 = arith.constant 0 : index
      %27 = vector.load %arg4[%c3, %c0_21] : memref<8x1024xf32, #tpu.memory_space<vmem>>, vector<1x1024xf32>
      %c0_22 = arith.constant 0 : index
      %c0_23 = arith.constant 0 : index
      %28 = vector.load %arg3[%c0_22, %c0_23] : memref<16x2xf32, #tpu.memory_space<vmem>>, vector<16x2xf32>
      %29 = vector.extract_strided_slice %28 {offsets = [0, 0], sizes = [16, 1], strides = [1, 1]} : vector<16x2xf32> to vector<16x1xf32>
      %30 = vector.broadcast %29 : vector<16x1xf32> to vector<16x1024xf32>
      %31 = vector.broadcast %25 : vector<1x1024xf32> to vector<16x1024xf32>
      %32 = arith.mulf %30, %31 : vector<16x1024xf32>
      %33 = vector.extract_strided_slice %28 {offsets = [0, 1], sizes = [16, 1], strides = [1, 1]} : vector<16x2xf32> to vector<16x1xf32>
      %34 = vector.broadcast %33 : vector<16x1xf32> to vector<16x1024xf32>
      %35 = vector.broadcast %26 : vector<1x1024xf32> to vector<16x1024xf32>
      %36 = arith.mulf %34, %35 : vector<16x1024xf32>
      %37 = arith.addf %32, %36 : vector<16x1024xf32>
      %38 = vector.broadcast %23 : f32 to vector<1x1024xf32>
      %39 = arith.mulf %38, %24 : vector<1x1024xf32>
      %40 = arith.addf %27, %39 : vector<1x1024xf32>
      %41 = vector.broadcast %40 : vector<1x1024xf32> to vector<16x1024xf32>
      %42 = arith.addf %37, %41 : vector<16x1024xf32>
      %cst_24 = arith.constant 0.000000e+00 : f32
      %43 = vector.broadcast %cst_24 : f32 to vector<16x1024xf32>
      %44 = arith.cmpf ogt, %42, %43 : vector<16x1024xf32>
      %cst_25 = arith.constant 0.00999999977 : f32
      %45 = vector.broadcast %cst_25 : f32 to vector<16x1024xf32>
      %46 = arith.mulf %45, %42 : vector<16x1024xf32>
      %47 = arith.select %44, %42, %46 : vector<16x1024xi1>, vector<16x1024xf32>
      %48 = arith.truncf %47 : vector<16x1024xf32> to vector<16x1024xbf16>
      %c0_26 = arith.constant 0 : index
      %c0_27 = arith.constant 0 : index
      %49 = vector.load %arg10[%c0_26, %c0_27] : memref<16x1024xbf16, #tpu.memory_space<vmem>>, vector<16x1024xbf16>
      tpu.vector_store %arg10[%c0_26, %c0_27], %48 {strides = array<i32>} : memref<16x1024xbf16, #tpu.memory_space<vmem>>, vector<16x1024xbf16>,
      %cst_28 = arith.constant 0.000000e+00 : f32
      %50 = vector.broadcast %cst_28 : f32 to vector<16x128xf32>
      %c0_29 = arith.constant 0 : index
      %c0_30 = arith.constant 0 : index
      %51 = vector.load %arg11[%c0_29, %c0_30] : memref<16x128xf32, #tpu.memory_space<vmem>>, vector<16x128xf32>
      tpu.vector_store %arg11[%c0_29, %c0_30], %50 {strides = array<i32>} : memref<16x128xf32, #tpu.memory_space<vmem>>, vector<16x128xf32>,
    } else {
    }
    %c0 = arith.constant 0 : index
    %c0_1 = arith.constant 0 : index
    %3 = vector.load %arg10[%c0, %c0_1] : memref<16x1024xbf16, #tpu.memory_space<vmem>>, vector<16x1024xbf16>
    %c0_2 = arith.constant 0 : index
    %c0_3 = arith.constant 0 : index
    %4 = vector.load %arg5[%c0_2, %c0_3] : memref<1024x256xbf16, #tpu.memory_space<vmem>>, vector<1024x256xbf16>
    %cst = arith.constant dense<0.000000e+00> : vector<16x256xf32>
    %5 = tpu.matmul %3, %4, %cst {dimension_numbers = #tpu.dot_dimension_numbers<[1], [0], [0], [1], [0, 0, 1, 1], [], []>} : vector<16x1024xbf16>, vector<1024x256xbf16>, vector<16x256xf32> -> vector<16x256xf32>
    %c0_4 = arith.constant 0 : index
    %c0_5 = arith.constant 0 : index
    %6 = vector.load %arg6[%c0_4, %c0_5] : memref<1x256xf32, #tpu.memory_space<vmem>>, vector<1x256xf32>
    %7 = vector.broadcast %6 : vector<1x256xf32> to vector<16x256xf32>
    %8 = arith.addf %5, %7 : vector<16x256xf32>
    %cst_6 = arith.constant 0.000000e+00 : f32
    %9 = vector.broadcast %cst_6 : f32 to vector<16x256xf32>
    %10 = arith.cmpf ogt, %8, %9 : vector<16x256xf32>
    %cst_7 = arith.constant 0.00999999977 : f32
    %11 = vector.broadcast %cst_7 : f32 to vector<16x256xf32>
    %12 = arith.mulf %11, %8 : vector<16x256xf32>
    %13 = arith.select %10, %8, %12 : vector<16x256xi1>, vector<16x256xf32>
    %c0_8 = arith.constant 0 : index
    %c0_9 = arith.constant 0 : index
    %14 = vector.load %arg11[%c0_8, %c0_9] : memref<16x128xf32, #tpu.memory_space<vmem>>, vector<16x128xf32>
    %15 = arith.truncf %13 : vector<16x256xf32> to vector<16x256xbf16>
    %c0_10 = arith.constant 0 : index
    %c0_11 = arith.constant 0 : index
    %16 = vector.load %arg7[%c0_10, %c0_11] : memref<256x128xbf16, #tpu.memory_space<vmem>>, vector<256x128xbf16>
    %cst_12 = arith.constant dense<0.000000e+00> : vector<16x128xf32>
    %17 = tpu.matmul %15, %16, %cst_12 {dimension_numbers = #tpu.dot_dimension_numbers<[1], [0], [0], [1], [0, 0, 1, 1], [], []>} : vector<16x256xbf16>, vector<256x128xbf16>, vector<16x128xf32> -> vector<16x128xf32>
    %18 = arith.addf %14, %17 : vector<16x128xf32>
    %c0_13 = arith.constant 0 : index
    %c0_14 = arith.constant 0 : index
    %19 = vector.load %arg11[%c0_13, %c0_14] : memref<16x128xf32, #tpu.memory_space<vmem>>, vector<16x128xf32>
    tpu.vector_store %arg11[%c0_13, %c0_14], %18 {strides = array<i32>} : memref<16x128xf32, #tpu.memory_space<vmem>>, vector<16x128xf32>,
    %c3_i32 = arith.constant 3 : i32
    %20 = arith.cmpi eq, %arg1, %c3_i32 : i32
    %21 = arith.extui %20 : i1 to i32
    %c0_i32_15 = arith.constant 0 : i32
    %22 = arith.cmpi ne, %21, %c0_i32_15 : i32
    scf.if %22 {
      %c0_16 = arith.constant 0 : index
      %c0_17 = arith.constant 0 : index
      %23 = vector.load %arg11[%c0_16, %c0_17] : memref<16x128xf32, #tpu.memory_space<vmem>>, vector<16x128xf32>
      %c0_18 = arith.constant 0 : index
      %c0_19 = arith.constant 0 : index
      %24 = vector.load %arg8[%c0_18, %c0_19] : memref<1x128xf32, #tpu.memory_space<vmem>>, vector<1x128xf32>
      %25 = vector.broadcast %24 : vector<1x128xf32> to vector<16x128xf32>
      %26 = arith.addf %23, %25 : vector<16x128xf32>
      %c0_20 = arith.constant 0 : index
      %c0_21 = arith.constant 0 : index
      %27 = vector.load %arg9[%c0_20, %c0_21] : memref<16x128xf32, #tpu.memory_space<vmem>>, vector<16x128xf32>
      tpu.vector_store %arg9[%c0_20, %c0_21], %26 {strides = array<i32>} : memref<16x128xf32, #tpu.memory_space<vmem>>, vector<16x128xf32>,
    } else {
    }
    return
  }
  func.func @transform_0(%arg0: i32, %arg1: i32) -> i32 {
    %c0_i32 = arith.constant 0 : i32
    %c0_i32_0 = arith.constant 0 : i32
    return %c0_i32 : i32
  }
  func.func @transform_1(%arg0: i32, %arg1: i32) -> (i32, i32) {
    %c0_i32 = arith.constant 0 : i32
    %c0_i32_0 = arith.constant 0 : i32
    return %arg0, %c0_i32 : i32, i32
  }
  func.func @transform_2(%arg0: i32, %arg1: i32) -> (i32, i32) {
    %c0_i32 = arith.constant 0 : i32
    %c0_i32_0 = arith.constant 0 : i32
    %c0_i32_1 = arith.constant 0 : i32
    return %c0_i32, %c0_i32_0 : i32, i32
  }
  func.func @transform_3(%arg0: i32, %arg1: i32) -> (i32, i32) {
    %c0_i32 = arith.constant 0 : i32
    %c0_i32_0 = arith.constant 0 : i32
    return %c0_i32, %arg1 : i32, i32
  }
  func.func @transform_4(%arg0: i32, %arg1: i32) -> (i32, i32) {
    %c0_i32 = arith.constant 0 : i32
    %c0_i32_0 = arith.constant 0 : i32
    return %c0_i32, %arg1 : i32, i32
  }
  func.func @transform_5(%arg0: i32, %arg1: i32) -> (i32, i32) {
    %c0_i32 = arith.constant 0 : i32
    %c0_i32_0 = arith.constant 0 : i32
    return %arg1, %c0_i32 : i32, i32
  }
  func.func @transform_6(%arg0: i32, %arg1: i32) -> (i32, i32) {
    %c0_i32 = arith.constant 0 : i32
    %c0_i32_0 = arith.constant 0 : i32
    %c0_i32_1 = arith.constant 0 : i32
    return %c0_i32, %c0_i32_0 : i32, i32
  }
  func.func @transform_7(%arg0: i32, %arg1: i32) -> (i32, i32) {
    %c0_i32 = arith.constant 0 : i32
    %c0_i32_0 = arith.constant 0 : i32
    return %arg0, %c0_i32 : i32, i32
  }
}

</mosaic_0001>

<bundles_post_ra>
// kernel: diffusion_denoiser_forward.1
= control target key start
LH: loop header
LB: loop body
LE: loop exit
PB: predicated region body
PF: predicated region fallthrough
CT: control target
= control target key end

     0   :  { %s3589_s0 = inlined_call_operand.<no memory space> [shape: f32[1], index: 0, kind: input, shape index: {}]   ;;  %s3590_s1 = inlined_call_operand.vmem [shape: f32[16,2], index: 1, kind: input, shape index: {}]   ;;  %s3591_s2 = inlined_call_operand.vmem [shape: f32[8,1024], index: 2, kind: input, shape index: {}]   ;;  %s3592_s3 = inlined_call_operand.vmem [shape: bf16[1024,1024], index: 3, kind: input, shape index: {}]   ;;  %s3593_s4 = inlined_call_operand.vmem [shape: f32[1,1024], index: 4, kind: input, shape index: {}]   ;;  %s3594_s5 = inlined_call_operand.vmem [shape: bf16[1024,128], index: 5, kind: input, shape index: {}]   ;;  %s3595_s6 = inlined_call_operand.vmem [shape: f32[1,128], index: 6, kind: input, shape index: {}]   ;;  %s3596_s7 = inlined_call_operand.vmem [shape: f32[16,128], index: 7, kind: output, shape index: {}]  }
   0x1   :  { %12 = sst [smem:[#allocation4]] %s3589_s0 }
   0x2   :  { %s3015_s26 = smov 0   ;;  %s3017_s27 = smov 0  }
   0x3   :  { %s3019_s28 = smov 0   ;;  %s3021_s29 = smov 0  }
   0x4   :  { %s3023_s30 = smov 0  }
   0x5 LB: > { %s27_s0 = sadd.s32 1, %s2963_s29  ;;  %p112_p1 = scmp.ne.s32.totalorder %s2955_s27, %s2951_s26  ;;  %s2967_s30 = sphi %s3023_s30, %s18_s30   ;;  %s2963_s29 = sphi %s3021_s29, %s3600_s29   ;;  %s2959_s28 = sphi %s3019_s28, %s3599_s28   ;;  %s2955_s27 = sphi %s3017_s27, %s3598_s27   ;;  %s2951_s26 = sphi %s3015_s26, %s3597_s26  }
   0x6   : > { %p28_p0 = scmp.ge.s32.totalorder %s27_s0, 4  ;;  %p113_p2 = scmp.eq.s32.totalorder %s2967_s30, 0 }
   0x7   : > { %s105_s9 = sadd.s32 1, %s2955_s27  ;;  %p2470_p5 = scmp.ge.s32.totalorder %s2967_s30, 4 }
   0x8   : > { %s3602_s0 = smov (%p28_p0, %s27_s0), 0  ;;  %p114_p3 = por %p113_p2, %p112_p1 }
   0x9   : > { %s102_s8 = ssub.s32 %s2963_s29, %s3602_s0  ;;  %255 = sbr.rel (%p2470_p5) target bundleno = 148 (0x94), region = 32 }
   0xa   : > { %p103_p4 = scmp.eq.s32.totalorder %s102_s8, 0 }
   0xc   : > { %s3050_s10 = scalar_select %p103_p4, %s2955_s27, %s105_s9  }
  0x10   : > { %258 = sbr.rel (!%p114_p3) target bundleno = 148 (0x94), region = 36  ;;  %s260_s11 = sand.u32 (%p114_p3), 1, %s2955_s27  }
  0x11   : > { %s2636_s12 = sshll.u32 (%p114_p3), %s2963_s29, 3  ;;  %s2471_s13 = sshll.u32 (%p114_p3), %s260_s11, 10 }
  0x12   : > { %s3058_s16 = scalar_lea.vmem (%p114_p3), %s3592_s3, %s2636_s12  ;;  %s3063_s17 = scalar_lea.vmem (%p114_p3), [#allocation5], %s2471_s13 }
  0x13   : > { %v547_v0 = vld [vmem:[%s3058_s16] sm:$0xff] (%p114_p3) }
  0x14   : > { %v549_v1 = vld [vmem:[%s3058_s16 + $0x20] sm:$0xff] (%p114_p3)  ;;  %548 = vst [vmem:[%s3063_s17] sm:$0xff] (%p114_p3), %v547_v0 }
  0x15   : > { %v551_v2 = vld [vmem:[%s3058_s16 + $0x40] sm:$0xff] (%p114_p3)  ;;  %550 = vst [vmem:[%s3063_s17 + $0x8] sm:$0xff] (%p114_p3), %v549_v1 }
  0x16   : > { %552 = vst [vmem:[%s3063_s17 + $0x10] sm:$0xff] (%p114_p3), %v551_v2  ;;  %v553_v3 = vld [vmem:[%s3058_s16 + $0x60] sm:$0xff] (%p114_p3) }
  0x17   : > { %v555_v4 = vld [vmem:[%s3058_s16 + $0x80] sm:$0xff]  ;;  %554 = vst [vmem:[%s3063_s17 + $0x18] sm:$0xff] %v553_v3 }
  0x18   : > { %v557_v5 = vld [vmem:[%s3058_s16 + $0xa0] sm:$0xff]  ;;  %556 = vst [vmem:[%s3063_s17 + $0x20] sm:$0xff] %v555_v4 }
  0x19   : > { %558 = vst [vmem:[%s3063_s17 + $0x28] sm:$0xff] %v557_v5  ;;  %v559_v6 = vld [vmem:[%s3058_s16 + $0xc0] sm:$0xff] }
  0x1a   : > { %v561_v7 = vld [vmem:[%s3058_s16 + $0xe0] sm:$0xff]  ;;  %560 = vst [vmem:[%s3063_s17 + $0x30] sm:$0xff] %v559_v6 }
  0x1b   : > { %v563_v8 = vld [vmem:[%s3058_s16 + $0x100] sm:$0xff]  ;;  %562 = vst [vmem:[%s3063_s17 + $0x38] sm:$0xff] %v561_v7 }
  0x1c   : > { %564 = vst [vmem:[%s3063_s17 + $0x40] sm:$0xff] %v563_v8  ;;  %v565_v9 = vld [vmem:[%s3058_s16 + $0x120] sm:$0xff] }
  0x1d   : > { %v567_v10 = vld [vmem:[%s3058_s16 + $0x140] sm:$0xff]  ;;  %566 = vst [vmem:[%s3063_s17 + $0x48] sm:$0xff] %v565_v9 }
  0x1e   : > { %v569_v11 = vld [vmem:[%s3058_s16 + $0x160] sm:$0xff]  ;;  %568 = vst [vmem:[%s3063_s17 + $0x50] sm:$0xff] %v567_v10 }
  0x1f   : > { %570 = vst [vmem:[%s3063_s17 + $0x58] sm:$0xff] %v569_v11  ;;  %v571_v12 = vld [vmem:[%s3058_s16 + $0x180] sm:$0xff] }
  0x20   : > { %v573_v13 = vld [vmem:[%s3058_s16 + $0x1a0] sm:$0xff]  ;;  %572 = vst [vmem:[%s3063_s17 + $0x60] sm:$0xff] %v571_v12 }
  0x21   : > { %v575_v14 = vld [vmem:[%s3058_s16 + $0x1c0] sm:$0xff]  ;;  %574 = vst [vmem:[%s3063_s17 + $0x68] sm:$0xff] %v573_v13 }
  0x22   : > { %576 = vst [vmem:[%s3063_s17 + $0x70] sm:$0xff] %v575_v14  ;;  %v577_v15 = vld [vmem:[%s3058_s16 + $0x1e0] sm:$0xff] }
  0x23   : > { %v579_v16 = vld [vmem:[%s3058_s16 + $0x200] sm:$0xff]  ;;  %578 = vst [vmem:[%s3063_s17 + $0x78] sm:$0xff] %v577_v15 }
  0x24   : > { %v581_v17 = vld [vmem:[%s3058_s16 + $0x220] sm:$0xff]  ;;  %580 = vst [vmem:[%s3063_s17 + $0x80] sm:$0xff] %v579_v16 }
  0x25   : > { %582 = vst [vmem:[%s3063_s17 + $0x88] sm:$0xff] %v581_v17  ;;  %v583_v18 = vld [vmem:[%s3058_s16 + $0x240] sm:$0xff] }
  0x26   : > { %v585_v19 = vld [vmem:[%s3058_s16 + $0x260] sm:$0xff]  ;;  %584 = vst [vmem:[%s3063_s17 + $0x90] sm:$0xff] %v583_v18 }
  0x27   : > { %v587_v20 = vld [vmem:[%s3058_s16 + $0x280] sm:$0xff]  ;;  %586 = vst [vmem:[%s3063_s17 + $0x98] sm:$0xff] %v585_v19 }
  0x28   : > { %588 = vst [vmem:[%s3063_s17 + $0xa0] sm:$0xff] %v587_v20  ;;  %v589_v21 = vld [vmem:[%s3058_s16 + $0x2a0] sm:$0xff] }
  0x29   : > { %v591_v22 = vld [vmem:[%s3058_s16 + $0x2c0] sm:$0xff]  ;;  %590 = vst [vmem:[%s3063_s17 + $0xa8] sm:$0xff] %v589_v21 }
  0x2a   : > { %v593_v23 = vld [vmem:[%s3058_s16 + $0x2e0] sm:$0xff]  ;;  %592 = vst [vmem:[%s3063_s17 + $0xb0] sm:$0xff] %v591_v22 }
  0x2b   : > { %594 = vst [vmem:[%s3063_s17 + $0xb8] sm:$0xff] %v593_v23  ;;  %v595_v24 = vld [vmem:[%s3058_s16 + $0x300] sm:$0xff] }
  0x2c   : > { %v597_v25 = vld [vmem:[%s3058_s16 + $0x320] sm:$0xff]  ;;  %596 = vst [vmem:[%s3063_s17 + $0xc0] sm:$0xff] %v595_v24 }
  0x2d   : > { %v599_v26 = vld [vmem:[%s3058_s16 + $0x340] sm:$0xff]  ;;  %598 = vst [vmem:[%s3063_s17 + $0xc8] sm:$0xff] %v597_v25 }
  0x2e   : > { %600 = vst [vmem:[%s3063_s17 + $0xd0] sm:$0xff] %v599_v26  ;;  %v601_v27 = vld [vmem:[%s3058_s16 + $0x360] sm:$0xff] }
  0x2f   : > { %v603_v28 = vld [vmem:[%s3058_s16 + $0x380] sm:$0xff]  ;;  %602 = vst [vmem:[%s3063_s17 + $0xd8] sm:$0xff] %v601_v27 }
  0x30   : > { %v605_v29 = vld [vmem:[%s3058_s16 + $0x3a0] sm:$0xff]  ;;  %604 = vst [vmem:[%s3063_s17 + $0xe0] sm:$0xff] %v603_v28 }
  0x31   : > { %606 = vst [vmem:[%s3063_s17 + $0xe8] sm:$0xff] %v605_v29  ;;  %v607_v30 = vld [vmem:[%s3058_s16 + $0x3c0] sm:$0xff] }
  0x32   : > { %v609_v31 = vld [vmem:[%s3058_s16 + $0x3e0] sm:$0xff]  ;;  %608 = vst [vmem:[%s3063_s17 + $0xf0] sm:$0xff] %v607_v30 }
  0x33   : > { %v611_v32 = vld [vmem:[%s3058_s16 + $0x400] sm:$0xff]  ;;  %610 = vst [vmem:[%s3063_s17 + $0xf8] sm:$0xff] %v609_v31 }
  0x34   : > { %612 = vst [vmem:[%s3063_s17 + $0x100] sm:$0xff] %v611_v32  ;;  %v613_v33 = vld [vmem:[%s3058_s16 + $0x420] sm:$0xff] }
  0x35   : > { %v615_v34 = vld [vmem:[%s3058_s16 + $0x440] sm:$0xff]  ;;  %614 = vst [vmem:[%s3063_s17 + $0x108] sm:$0xff] %v613_v33 }
  0x36   : > { %v617_v35 = vld [vmem:[%s3058_s16 + $0x460] sm:$0xff]  ;;  %616 = vst [vmem:[%s3063_s17 + $0x110] sm:$0xff] %v615_v34 }
  0x37   : > { %618 = vst [vmem:[%s3063_s17 + $0x118] sm:$0xff] %v617_v35  ;;  %v619_v36 = vld [vmem:[%s3058_s16 + $0x480] sm:$0xff] }
  0x38   : > { %v621_v37 = vld [vmem:[%s3058_s16 + $0x4a0] sm:$0xff]  ;;  %620 = vst [vmem:[%s3063_s17 + $0x120] sm:$0xff] %v619_v36 }
  0x39   : > { %v623_v38 = vld [vmem:[%s3058_s16 + $0x4c0] sm:$0xff]  ;;  %622 = vst [vmem:[%s3063_s17 + $0x128] sm:$0xff] %v621_v37 }
  0x3a   : > { %624 = vst [vmem:[%s3063_s17 + $0x130] sm:$0xff] %v623_v38  ;;  %v625_v39 = vld [vmem:[%s3058_s16 + $0x4e0] sm:$0xff] }
  0x3b   : > { %v627_v40 = vld [vmem:[%s3058_s16 + $0x500] sm:$0xff]  ;;  %626 = vst [vmem:[%s3063_s17 + $0x138] sm:$0xff] %v625_v39 }
  0x3c   : > { %v629_v41 = vld [vmem:[%s3058_s16 + $0x520] sm:$0xff]  ;;  %628 = vst [vmem:[%s3063_s17 + $0x140] sm:$0xff] %v627_v40 }
  0x3d   : > { %630 = vst [vmem:[%s3063_s17 + $0x148] sm:$0xff] %v629_v41  ;;  %v631_v42 = vld [vmem:[%s3058_s16 + $0x540] sm:$0xff] }
  0x3e   : > { %v633_v43 = vld [vmem:[%s3058_s16 + $0x560] sm:$0xff]  ;;  %632 = vst [vmem:[%s3063_s17 + $0x150] sm:$0xff] %v631_v42 }
  0x3f   : > { %v635_v44 = vld [vmem:[%s3058_s16 + $0x580] sm:$0xff]  ;;  %634 = vst [vmem:[%s3063_s17 + $0x158] sm:$0xff] %v633_v43 }
  0x40   : > { %636 = vst [vmem:[%s3063_s17 + $0x160] sm:$0xff] %v635_v44  ;;  %v637_v45 = vld [vmem:[%s3058_s16 + $0x5a0] sm:$0xff] }
  0x41   : > { %v639_v46 = vld [vmem:[%s3058_s16 + $0x5c0] sm:$0xff]  ;;  %638 = vst [vmem:[%s3063_s17 + $0x168] sm:$0xff] %v637_v45 }
  0x42   : > { %v641_v47 = vld [vmem:[%s3058_s16 + $0x5e0] sm:$0xff]  ;;  %640 = vst [vmem:[%s3063_s17 + $0x170] sm:$0xff] %v639_v46 }
  0x43   : > { %642 = vst [vmem:[%s3063_s17 + $0x178] sm:$0xff] %v641_v47  ;;  %v643_v48 = vld [vmem:[%s3058_s16 + $0x600] sm:$0xff] }
  0x44   : > { %v645_v49 = vld [vmem:[%s3058_s16 + $0x620] sm:$0xff]  ;;  %644 = vst [vmem:[%s3063_s17 + $0x180] sm:$0xff] %v643_v48 }
  0x45   : > { %v647_v50 = vld [vmem:[%s3058_s16 + $0x640] sm:$0xff]  ;;  %646 = vst [vmem:[%s3063_s17 + $0x188] sm:$0xff] %v645_v49 }
  0x46   : > { %648 = vst [vmem:[%s3063_s17 + $0x190] sm:$0xff] %v647_v50  ;;  %v649_v51 = vld [vmem:[%s3058_s16 + $0x660] sm:$0xff] }
  0x47   : > { %v651_v52 = vld [vmem:[%s3058_s16 + $0x680] sm:$0xff]  ;;  %650 = vst [vmem:[%s3063_s17 + $0x198] sm:$0xff] %v649_v51 }
  0x48   : > { %v653_v53 = vld [vmem:[%s3058_s16 + $0x6a0] sm:$0xff]  ;;  %652 = vst [vmem:[%s3063_s17 + $0x1a0] sm:$0xff] %v651_v52 }
  0x49   : > { %654 = vst [vmem:[%s3063_s17 + $0x1a8] sm:$0xff] %v653_v53  ;;  %v655_v54 = vld [vmem:[%s3058_s16 + $0x6c0] sm:$0xff] }
  0x4a   : > { %v657_v55 = vld [vmem:[%s3058_s16 + $0x6e0] sm:$0xff]  ;;  %656 = vst [vmem:[%s3063_s17 + $0x1b0] sm:$0xff] %v655_v54 }
  0x4b   : > { %v659_v56 = vld [vmem:[%s3058_s16 + $0x700] sm:$0xff]  ;;  %658 = vst [vmem:[%s3063_s17 + $0x1b8] sm:$0xff] %v657_v55 }
  0x4c   : > { %660 = vst [vmem:[%s3063_s17 + $0x1c0] sm:$0xff] %v659_v56  ;;  %v661_v57 = vld [vmem:[%s3058_s16 + $0x720] sm:$0xff] }
  0x4d   : > { %v663_v58 = vld [vmem:[%s3058_s16 + $0x740] sm:$0xff]  ;;  %662 = vst [vmem:[%s3063_s17 + $0x1c8] sm:$0xff] %v661_v57 }
  0x4e   : > { %v665_v59 = vld [vmem:[%s3058_s16 + $0x760] sm:$0xff]  ;;  %664 = vst [vmem:[%s3063_s17 + $0x1d0] sm:$0xff] %v663_v58 }
  0x4f   : > { %666 = vst [vmem:[%s3063_s17 + $0x1d8] sm:$0xff] %v665_v59  ;;  %v667_v60 = vld [vmem:[%s3058_s16 + $0x780] sm:$0xff] }
  0x50   : > { %v669_v61 = vld [vmem:[%s3058_s16 + $0x7a0] sm:$0xff]  ;;  %668 = vst [vmem:[%s3063_s17 + $0x1e0] sm:$0xff] %v667_v60 }
  0x51   : > { %v671_v62 = vld [vmem:[%s3058_s16 + $0x7c0] sm:$0xff]  ;;  %670 = vst [vmem:[%s3063_s17 + $0x1e8] sm:$0xff] %v669_v61 }
  0x52   : > { %672 = vst [vmem:[%s3063_s17 + $0x1f0] sm:$0xff] %v671_v62  ;;  %v673_v63 = vld [vmem:[%s3058_s16 + $0x7e0] sm:$0xff] }
  0x53   : > { %v675_v0 = vld [vmem:[%s3058_s16 + $0x800] sm:$0xff]  ;;  %674 = vst [vmem:[%s3063_s17 + $0x1f8] sm:$0xff] %v673_v63 }
  0x54   : > { %v677_v1 = vld [vmem:[%s3058_s16 + $0x820] sm:$0xff]  ;;  %676 = vst [vmem:[%s3063_s17 + $0x200] sm:$0xff] %v675_v0 }
  0x55   : > { %678 = vst [vmem:[%s3063_s17 + $0x208] sm:$0xff] %v677_v1  ;;  %v679_v2 = vld [vmem:[%s3058_s16 + $0x840] sm:$0xff] }
  0x56   : > { %v681_v3 = vld [vmem:[%s3058_s16 + $0x860] sm:$0xff]  ;;  %680 = vst [vmem:[%s3063_s17 + $0x210] sm:$0xff] %v679_v2 }
  0x57   : > { %v683_v4 = vld [vmem:[%s3058_s16 + $0x880] sm:$0xff]  ;;  %682 = vst [vmem:[%s3063_s17 + $0x218] sm:$0xff] %v681_v3 }
  0x58   : > { %684 = vst [vmem:[%s3063_s17 + $0x220] sm:$0xff] %v683_v4  ;;  %v685_v5 = vld [vmem:[%s3058_s16 + $0x8a0] sm:$0xff] }
  0x59   : > { %v687_v6 = vld [vmem:[%s3058_s16 + $0x8c0] sm:$0xff]  ;;  %686 = vst [vmem:[%s3063_s17 + $0x228] sm:$0xff] %v685_v5 }
  0x5a   : > { %v689_v7 = vld [vmem:[%s3058_s16 + $0x8e0] sm:$0xff]  ;;  %688 = vst [vmem:[%s3063_s17 + $0x230] sm:$0xff] %v687_v6 }
  0x5b   : > { %690 = vst [vmem:[%s3063_s17 + $0x238] sm:$0xff] %v689_v7  ;;  %v691_v8 = vld [vmem:[%s3058_s16 + $0x900] sm:$0xff] }
  0x5c   : > { %v693_v9 = vld [vmem:[%s3058_s16 + $0x920] sm:$0xff]  ;;  %692 = vst [vmem:[%s3063_s17 + $0x240] sm:$0xff] %v691_v8 }
  0x5d   : > { %v695_v10 = vld [vmem:[%s3058_s16 + $0x940] sm:$0xff]  ;;  %694 = vst [vmem:[%s3063_s17 + $0x248] sm:$0xff] %v693_v9 }
  0x5e   : > { %696 = vst [vmem:[%s3063_s17 + $0x250] sm:$0xff] %v695_v10  ;;  %v697_v11 = vld [vmem:[%s3058_s16 + $0x960] sm:$0xff] }
  0x5f   : > { %v699_v12 = vld [vmem:[%s3058_s16 + $0x980] sm:$0xff]  ;;  %698 = vst [vmem:[%s3063_s17 + $0x258] sm:$0xff] %v697_v11 }
  0x60   : > { %v701_v13 = vld [vmem:[%s3058_s16 + $0x9a0] sm:$0xff]  ;;  %700 = vst [vmem:[%s3063_s17 + $0x260] sm:$0xff] %v699_v12 }
  0x61   : > { %702 = vst [vmem:[%s3063_s17 + $0x268] sm:$0xff] %v701_v13  ;;  %v703_v14 = vld [vmem:[%s3058_s16 + $0x9c0] sm:$0xff] }
  0x62   : > { %v705_v15 = vld [vmem:[%s3058_s16 + $0x9e0] sm:$0xff]  ;;  %704 = vst [vmem:[%s3063_s17 + $0x270] sm:$0xff] %v703_v14 }
  0x63   : > { %v707_v16 = vld [vmem:[%s3058_s16 + $0xa00] sm:$0xff]  ;;  %706 = vst [vmem:[%s3063_s17 + $0x278] sm:$0xff] %v705_v15 }
  0x64   : > { %708 = vst [vmem:[%s3063_s17 + $0x280] sm:$0xff] %v707_v16  ;;  %v709_v17 = vld [vmem:[%s3058_s16 + $0xa20] sm:$0xff] }
  0x65   : > { %v711_v18 = vld [vmem:[%s3058_s16 + $0xa40] sm:$0xff]  ;;  %710 = vst [vmem:[%s3063_s17 + $0x288] sm:$0xff] %v709_v17 }
  0x66   : > { %v713_v19 = vld [vmem:[%s3058_s16 + $0xa60] sm:$0xff]  ;;  %712 = vst [vmem:[%s3063_s17 + $0x290] sm:$0xff] %v711_v18 }
  0x67   : > { %714 = vst [vmem:[%s3063_s17 + $0x298] sm:$0xff] %v713_v19  ;;  %v715_v20 = vld [vmem:[%s3058_s16 + $0xa80] sm:$0xff] }
  0x68   : > { %v717_v21 = vld [vmem:[%s3058_s16 + $0xaa0] sm:$0xff]  ;;  %716 = vst [vmem:[%s3063_s17 + $0x2a0] sm:$0xff] %v715_v20 }
  0x69   : > { %v719_v22 = vld [vmem:[%s3058_s16 + $0xac0] sm:$0xff]  ;;  %718 = vst [vmem:[%s3063_s17 + $0x2a8] sm:$0xff] %v717_v21 }
  0x6a   : > { %720 = vst [vmem:[%s3063_s17 + $0x2b0] sm:$0xff] %v719_v22  ;;  %v721_v23 = vld [vmem:[%s3058_s16 + $0xae0] sm:$0xff] }
  0x6b   : > { %v723_v24 = vld [vmem:[%s3058_s16 + $0xb00] sm:$0xff]  ;;  %722 = vst [vmem:[%s3063_s17 + $0x2b8] sm:$0xff] %v721_v23 }
  0x6c   : > { %v725_v25 = vld [vmem:[%s3058_s16 + $0xb20] sm:$0xff]  ;;  %724 = vst [vmem:[%s3063_s17 + $0x2c0] sm:$0xff] %v723_v24 }
  0x6d   : > { %726 = vst [vmem:[%s3063_s17 + $0x2c8] sm:$0xff] %v725_v25  ;;  %v727_v26 = vld [vmem:[%s3058_s16 + $0xb40] sm:$0xff] }
  0x6e   : > { %v729_v27 = vld [vmem:[%s3058_s16 + $0xb60] sm:$0xff]  ;;  %728 = vst [vmem:[%s3063_s17 + $0x2d0] sm:$0xff] %v727_v26 }
  0x6f   : > { %v731_v28 = vld [vmem:[%s3058_s16 + $0xb80] sm:$0xff]  ;;  %730 = vst [vmem:[%s3063_s17 + $0x2d8] sm:$0xff] %v729_v27 }
  0x70   : > { %732 = vst [vmem:[%s3063_s17 + $0x2e0] sm:$0xff] %v731_v28  ;;  %v733_v29 = vld [vmem:[%s3058_s16 + $0xba0] sm:$0xff] }
  0x71   : > { %v735_v30 = vld [vmem:[%s3058_s16 + $0xbc0] sm:$0xff]  ;;  %734 = vst [vmem:[%s3063_s17 + $0x2e8] sm:$0xff] %v733_v29 }
  0x72   : > { %v737_v31 = vld [vmem:[%s3058_s16 + $0xbe0] sm:$0xff]  ;;  %736 = vst [vmem:[%s3063_s17 + $0x2f0] sm:$0xff] %v735_v30 }
  0x73   : > { %738 = vst [vmem:[%s3063_s17 + $0x2f8] sm:$0xff] %v737_v31  ;;  %v739_v32 = vld [vmem:[%s3058_s16 + $0xc00] sm:$0xff] }
  0x74   : > { %v741_v33 = vld [vmem:[%s3058_s16 + $0xc20] sm:$0xff]  ;;  %740 = vst [vmem:[%s3063_s17 + $0x300] sm:$0xff] %v739_v32 }
  0x75   : > { %v743_v34 = vld [vmem:[%s3058_s16 + $0xc40] sm:$0xff]  ;;  %742 = vst [vmem:[%s3063_s17 + $0x308] sm:$0xff] %v741_v33 }
  0x76   : > { %744 = vst [vmem:[%s3063_s17 + $0x310] sm:$0xff] %v743_v34  ;;  %v745_v35 = vld [vmem:[%s3058_s16 + $0xc60] sm:$0xff] }
  0x77   : > { %v747_v36 = vld [vmem:[%s3058_s16 + $0xc80] sm:$0xff]  ;;  %746 = vst [vmem:[%s3063_s17 + $0x318] sm:$0xff] %v745_v35 }
  0x78   : > { %v749_v37 = vld [vmem:[%s3058_s16 + $0xca0] sm:$0xff]  ;;  %748 = vst [vmem:[%s3063_s17 + $0x320] sm:$0xff] %v747_v36 }
  0x79   : > { %750 = vst [vmem:[%s3063_s17 + $0x328] sm:$0xff] %v749_v37  ;;  %v751_v38 = vld [vmem:[%s3058_s16 + $0xcc0] sm:$0xff] }
  0x7a   : > { %v753_v39 = vld [vmem:[%s3058_s16 + $0xce0] sm:$0xff]  ;;  %752 = vst [vmem:[%s3063_s17 + $0x330] sm:$0xff] %v751_v38 }
  0x7b   : > { %v755_v40 = vld [vmem:[%s3058_s16 + $0xd00] sm:$0xff]  ;;  %754 = vst [vmem:[%s3063_s17 + $0x338] sm:$0xff] %v753_v39 }
  0x7c   : > { %756 = vst [vmem:[%s3063_s17 + $0x340] sm:$0xff] %v755_v40  ;;  %v757_v41 = vld [vmem:[%s3058_s16 + $0xd20] sm:$0xff] }
  0x7d   : > { %v759_v42 = vld [vmem:[%s3058_s16 + $0xd40] sm:$0xff]  ;;  %758 = vst [vmem:[%s3063_s17 + $0x348] sm:$0xff] %v757_v41 }
  0x7e   : > { %v761_v43 = vld [vmem:[%s3058_s16 + $0xd60] sm:$0xff]  ;;  %760 = vst [vmem:[%s3063_s17 + $0x350] sm:$0xff] %v759_v42 }
  0x7f   : > { %762 = vst [vmem:[%s3063_s17 + $0x358] sm:$0xff] %v761_v43  ;;  %v763_v44 = vld [vmem:[%s3058_s16 + $0xd80] sm:$0xff] }
  0x80   : > { %v765_v45 = vld [vmem:[%s3058_s16 + $0xda0] sm:$0xff]  ;;  %764 = vst [vmem:[%s3063_s17 + $0x360] sm:$0xff] %v763_v44 }
  0x81   : > { %v767_v46 = vld [vmem:[%s3058_s16 + $0xdc0] sm:$0xff]  ;;  %766 = vst [vmem:[%s3063_s17 + $0x368] sm:$0xff] %v765_v45 }
  0x82   : > { %768 = vst [vmem:[%s3063_s17 + $0x370] sm:$0xff] %v767_v46  ;;  %v769_v47 = vld [vmem:[%s3058_s16 + $0xde0] sm:$0xff] }
  0x83   : > { %v771_v48 = vld [vmem:[%s3058_s16 + $0xe00] sm:$0xff]  ;;  %770 = vst [vmem:[%s3063_s17 + $0x378] sm:$0xff] %v769_v47 }
  0x84   : > { %v773_v49 = vld [vmem:[%s3058_s16 + $0xe20] sm:$0xff]  ;;  %772 = vst [vmem:[%s3063_s17 + $0x380] sm:$0xff] %v771_v48 }
  0x85   : > { %774 = vst [vmem:[%s3063_s17 + $0x388] sm:$0xff] %v773_v49  ;;  %v775_v50 = vld [vmem:[%s3058_s16 + $0xe40] sm:$0xff] }
  0x86   : > { %v777_v51 = vld [vmem:[%s3058_s16 + $0xe60] sm:$0xff]  ;;  %776 = vst [vmem:[%s3063_s17 + $0x390] sm:$0xff] %v775_v50 }
  0x87   : > { %v779_v52 = vld [vmem:[%s3058_s16 + $0xe80] sm:$0xff]  ;;  %778 = vst [vmem:[%s3063_s17 + $0x398] sm:$0xff] %v777_v51 }
  0x88   : > { %780 = vst [vmem:[%s3063_s17 + $0x3a0] sm:$0xff] %v779_v52  ;;  %v781_v53 = vld [vmem:[%s3058_s16 + $0xea0] sm:$0xff] }
  0x89   : > { %v783_v54 = vld [vmem:[%s3058_s16 + $0xec0] sm:$0xff]  ;;  %782 = vst [vmem:[%s3063_s17 + $0x3a8] sm:$0xff] %v781_v53 }
  0x8a   : > { %v785_v55 = vld [vmem:[%s3058_s16 + $0xee0] sm:$0xff]  ;;  %784 = vst [vmem:[%s3063_s17 + $0x3b0] sm:$0xff] %v783_v54 }
  0x8b   : > { %786 = vst [vmem:[%s3063_s17 + $0x3b8] sm:$0xff] %v785_v55  ;;  %v787_v56 = vld [vmem:[%s3058_s16 + $0xf00] sm:$0xff] }
  0x8c   : > { %v789_v57 = vld [vmem:[%s3058_s16 + $0xf20] sm:$0xff]  ;;  %788 = vst [vmem:[%s3063_s17 + $0x3c0] sm:$0xff] %v787_v56 }
  0x8d   : > { %v791_v58 = vld [vmem:[%s3058_s16 + $0xf40] sm:$0xff]  ;;  %790 = vst [vmem:[%s3063_s17 + $0x3c8] sm:$0xff] %v789_v57 }
  0x8e   : > { %792 = vst [vmem:[%s3063_s17 + $0x3d0] sm:$0xff] %v791_v58  ;;  %v793_v59 = vld [vmem:[%s3058_s16 + $0xf60] sm:$0xff] }
  0x8f   : > { %v795_v60 = vld [vmem:[%s3058_s16 + $0xf80] sm:$0xff]  ;;  %794 = vst [vmem:[%s3063_s17 + $0x3d8] sm:$0xff] %v793_v59 }
  0x90   : > { %v797_v61 = vld [vmem:[%s3058_s16 + $0xfa0] sm:$0xff]  ;;  %796 = vst [vmem:[%s3063_s17 + $0x3e0] sm:$0xff] %v795_v60 }
  0x91   : > { %798 = vst [vmem:[%s3063_s17 + $0x3e8] sm:$0xff] %v797_v61  ;;  %v799_v62 = vld [vmem:[%s3058_s16 + $0xfc0] sm:$0xff] }
  0x92   : > { %v801_v63 = vld [vmem:[%s3058_s16 + $0xfe0] sm:$0xff]  ;;  %800 = vst [vmem:[%s3063_s17 + $0x3f0] sm:$0xff] %v799_v62 }
  0x93   : > { %802 = vst [vmem:[%s3063_s17 + $0x3f8] sm:$0xff] %v801_v63 }
  0x94 PF: > { %p2474_p6 = scmp.ge.s32.totalorder %s2967_s30, 1  ;;  %p824_p7 = scmp.lt.s32.totalorder %s2967_s30, 5 }
  0x96   : > { %p825_p8 = pnand %p2474_p6, %p824_p7 }
  0x97   : > { %s831_s18 = sand.u32 (!%p825_p8), 1, %s2951_s26   ;;  %s2476_s19 = sshll.u32 (!%p825_p8), %s2959_s28, 1 }
  0x98   : > { %828 = sbr.rel (%p825_p8) target bundleno = 908 (0x38c), region = 82  ;;  %s2475_s20 = sshll.u32 (!%p825_p8), %s831_s18, 10 }
  0x99   : > { %p884_p9 = scmp.lt.s32.totalorder (!%p825_p8), %s2476_s19, 7  ;;  %s2477_s21 = sshll.u32 (!%p825_p8), %s2959_s28, 5 }
  0x9a   : > { %p889_p10 = scmp.lt.s32.totalorder (!%p825_p8), %s2477_s21, 127  ;;  %s3334_s26 = scalar_lea.vmem (!%p825_p8), [#allocation5], %s2475_s20 }
  0x9b   : > { %p2479_p11 = scmp.ne.s32.totalorder (!%p825_p8), %s2959_s28, 0 }
  0x9f   : > { %s3604_s19 = smov (!%p884_p9, %s2476_s19), 7  ;;  %s3606_s21 = smov (!%p889_p10, %s2477_s21), 127 }
  0xa0   : > { %s886_s24 = scalar_lea.vmem %s3593_s4, %s3604_s19  ;;  %s2478_s25 = sshll.u32 %s3606_s21, 2  ;;  %v921_v0 = vld [vmem:[%s3590_s1] sm:$0xff] (!%p2479_p11)  ;;  %v2969_v1 = vmov (!%p2479_p11), 1   ;;  %v2970_v2 = vmov (!%p2479_p11), 0   ;;  %v922_v3 = vld [vmem:[%s3590_s1 + $0x8] sm:$0xff] (!%p2479_p11)  ;;  %v2971_v4 = vmov (!%p2479_p11), 0.0   ;;  %v934_v5 = vlaneseq (!%p2479_p11) }
  0xa1   : > { %s3332_s11 = scalar_lea.vmem %s3594_s5, %s2478_s25  ;;  %904 = sbr.rel (%p2479_p11) target bundleno = 324 (0x144), region = 90  ;;  %2719 = vset.pattern.permute.xlu1 (!%p2479_p11), %v2969_v1  ;;  %2718 = vset.pattern.permute.xlu0 (!%p2479_p11), %v2970_v2  ;;  %1195 = vst [vmem:[#allocation3] sm:$0xff] (!%p2479_p11), %v2971_v4  ;;  %1196 = vst [vmem:[#allocation3 + $0x8] sm:$0xff] (!%p2479_p11), %v2971_v4  ;;  %v906_v6 = vld [vmem:[%s3591_s2] ss:$8 sm:$0xf] (!%p2479_p11) }
  0xa2   : > { %991 = vperm.xlu1 (!%p2479_p11), %2719, %v921_v0   ;;  %925 = vperm.xlu0 (!%p2479_p11), %2718, %v921_v0   ;;  %s905_s16 = sld [smem:[#allocation4]] (!%p2479_p11)  ;;  %v907_v7 = vld [vmem:[%s3591_s2] ss:$8 sm:$0xf0] (!%p2479_p11)  ;;  %v935_v8 = vshrl.u32 (!%p2479_p11), %v934_v5, 7 }
  0xa3   : > { %v2482_v9 = vld [vmem:[%s3591_s2 + $0x2] ss:$8 sm:$0xf] (!%p2479_p11)  ;;  %v908_v11 = vor.u32 (!%p2479_p11), %v907_v7, %v906_v6  ;;  %v2484_v12 = vld [vmem:[%s3591_s2 + $0x3] ss:$8 sm:$0xf] (!%p2479_p11) }
  0xa4   : > { %v2483_v10 = vld [vmem:[%s3591_s2 + $0x2] ss:$8 sm:$0xf0] (!%p2479_p11)  ;;  %v2485_v13 = vld [vmem:[%s3591_s2 + $0x3] ss:$8 sm:$0xf0] (!%p2479_p11) }
  0xa5   : > { %v2480_v15 = vld [vmem:[%s3591_s2 + $0x1] ss:$8 sm:$0xf] (!%p2479_p11)  ;;  %v936_v16 = vsub.s32 (!%p2479_p11), 0, %v935_v8  ;;  %v940_v17 = vsub.s32 (!%p2479_p11), 1, %v935_v8  ;;  %v916_v18 = vor.u32 (!%p2479_p11), %v2483_v10, %v2482_v9  ;;  %v944_v20 = vsub.s32 (!%p2479_p11), 2, %v935_v8 }
  0xa6   : > { %995 = vperm.xlu1 (!%p2479_p11), %2719, %v922_v3   ;;  %930 = vperm.xlu0 (!%p2479_p11), %2718, %v922_v3   ;;  %v2481_v19 = vld [vmem:[%s3591_s2 + $0x1] ss:$8 sm:$0xf0] (!%p2479_p11)  ;;  %v948_v21 = vsub.s32 (!%p2479_p11), 3, %v935_v8  ;;  %v920_v22 = vor.u32 (!%p2479_p11), %v2485_v13, %v2484_v12  ;;  %v952_v24 = vsub.s32 (!%p2479_p11), 4, %v935_v8  ;;  %v956_v25 = vsub.s32 (!%p2479_p11), 5, %v935_v8 }
  0xa7   : > { %v960_v26 = vsub.s32 (!%p2479_p11), 6, %v935_v8  ;;  %v964_v27 = vsub.s32 (!%p2479_p11), 7, %v935_v8  ;;  %v912_v28 = vor.u32 (!%p2479_p11), %v2481_v19, %v2480_v15  ;;  %v1002_v29 = vrot.slane (!%p2479_p11), %v916_v18, %v936_v16 }
  0xa8   : > { %v1071_v14 = vstv %s905_s16  ;;  %v1006_v30 = vrot.slane %v916_v18, %v940_v17  ;;  %v1010_v31 = vrot.slane %v916_v18, %v944_v20  ;;  %v1014_v32 = vrot.slane %v916_v18, %v948_v21 }
  0xa9   : > { %v1072_v23 = vmul.f32 %v1071_v14, %v908_v11  ;;  %v1018_v34 = vrot.slane %v916_v18, %v952_v24  ;;  %v1022_v35 = vrot.slane %v916_v18, %v956_v25  ;;  %v1026_v36 = vrot.slane %v916_v18, %v960_v26 }
  0xaa   : > { %2720 = vset.pattern.permute.xlu0 %v2969_v1  ;;  %v1030_v37 = vrot.slane %v916_v18, %v964_v27  ;;  %v937_v38 = vrot.slane %v912_v28, %v936_v16  ;;  %v941_v39 = vrot.slane %v912_v28, %v940_v17  ;;  %v945_v40 = vrot.slane %v912_v28, %v944_v20 }
  0xab   : > { %v1073_v33 = vadd.f32 %v1072_v23, %v920_v22  ;;  %v949_v41 = vrot.slane %v912_v28, %v948_v21  ;;  %v953_v42 = vrot.slane %v912_v28, %v952_v24  ;;  %v957_v43 = vrot.slane %v912_v28, %v956_v25 }
  0xac   : > { %v961_v44 = vrot.slane %v912_v28, %v960_v26  ;;  %v965_v45 = vrot.slane %v912_v28, %v964_v27 }
  0xad   : > { %v3367_v46 = vrot.slane %v1073_v33, %v936_v16  ;;  %v3369_v47 = vrot.slane %v1073_v33, %v940_v17  ;;  %v3371_v48 = vrot.slane %v1073_v33, %v944_v20  ;;  %v3373_v49 = vrot.slane %v1073_v33, %v948_v21 }
  0xae   : > { %v3375_v52 = vrot.slane %v1073_v33, %v952_v24  ;;  %v3377_v53 = vrot.slane %v1073_v33, %v956_v25  ;;  %v3379_v54 = vrot.slane %v1073_v33, %v960_v26  ;;  %v3381_v55 = vrot.slane %v1073_v33, %v964_v27 }
 0x121   : > { %v992_v50 = vpop.permute.xlu1 %991  ;;  %v926_v51 = vpop.permute.xlu0 %925 }
 0x122   : > { %v1039_v56 = vmul.f32 %v1002_v29, %v992_v50  ;;  %v1040_v57 = vmul.f32 %v1006_v30, %v992_v50  ;;  %v1041_v58 = vmul.f32 %v1010_v31, %v992_v50  ;;  %v1042_v59 = vmul.f32 %v1014_v32, %v992_v50 }
 0x123   : > { %v1043_v60 = vmul.f32 %v1018_v34, %v992_v50  ;;  %v1044_v61 = vmul.f32 %v1022_v35, %v992_v50  ;;  %v1045_v62 = vmul.f32 %v1026_v36, %v992_v50  ;;  %v1046_v63 = vmul.f32 %v1030_v37, %v992_v50 }
 0x124   : > { %v974_v0 = vmul.f32 %v937_v38, %v926_v51  ;;  %v975_v1 = vmul.f32 %v941_v39, %v926_v51  ;;  %v976_v2 = vmul.f32 %v945_v40, %v926_v51  ;;  %v977_v3 = vmul.f32 %v949_v41, %v926_v51 }
 0x125   : > { %v996_v4 = vpop.permute.xlu1 %995  ;;  %v931_v5 = vpop.permute.xlu0 %930  ;;  %v978_v6 = vmul.f32 %v953_v42, %v926_v51  ;;  %v979_v7 = vmul.f32 %v957_v43, %v926_v51  ;;  %v980_v8 = vmul.f32 %v961_v44, %v926_v51  ;;  %v981_v9 = vmul.f32 %v965_v45, %v926_v51 }
 0x126   : > { %v1047_v10 = vmul.f32 %v1002_v29, %v996_v4  ;;  %v1048_v11 = vmul.f32 %v1006_v30, %v996_v4  ;;  %v1049_v12 = vmul.f32 %v1010_v31, %v996_v4  ;;  %v1050_v13 = vmul.f32 %v1014_v32, %v996_v4 }
 0x127   : > { %v1051_v14 = vmul.f32 %v1018_v34, %v996_v4  ;;  %v1052_v15 = vmul.f32 %v1022_v35, %v996_v4  ;;  %v1053_v16 = vmul.f32 %v1026_v36, %v996_v4  ;;  %v1054_v17 = vmul.f32 %v1030_v37, %v996_v4 }
 0x128   : > { %v982_v18 = vmul.f32 %v937_v38, %v931_v5  ;;  %v983_v19 = vmul.f32 %v941_v39, %v931_v5  ;;  %v984_v20 = vmul.f32 %v945_v40, %v931_v5  ;;  %v985_v21 = vmul.f32 %v949_v41, %v931_v5 }
 0x129   : > { %v986_v22 = vmul.f32 %v953_v42, %v931_v5  ;;  %v987_v23 = vmul.f32 %v957_v43, %v931_v5  ;;  %v988_v24 = vmul.f32 %v961_v44, %v931_v5  ;;  %v989_v25 = vmul.f32 %v965_v45, %v931_v5 }
 0x12a   : > { %v1055_v26 = vadd.f32 %v1039_v56, %v974_v0  ;;  %v1056_v27 = vadd.f32 %v1040_v57, %v975_v1  ;;  %v1057_v28 = vadd.f32 %v1041_v58, %v976_v2  ;;  %v1058_v33 = vadd.f32 %v1042_v59, %v977_v3 }
 0x12b   : > { %v1059_v29 = vadd.f32 %v1043_v60, %v978_v6  ;;  %v1060_v30 = vadd.f32 %v1044_v61, %v979_v7  ;;  %v1061_v31 = vadd.f32 %v1045_v62, %v980_v8  ;;  %v1062_v32 = vadd.f32 %v1046_v63, %v981_v9 }
 0x12c   : > { %v1063_v34 = vadd.f32 %v1047_v10, %v982_v18  ;;  %v1064_v35 = vadd.f32 %v1048_v11, %v983_v19  ;;  %v1065_v36 = vadd.f32 %v1049_v12, %v984_v20  ;;  %v1066_v37 = vadd.f32 %v1050_v13, %v985_v21 }
 0x12d   : > { %v1067_v38 = vadd.f32 %v1051_v14, %v986_v22  ;;  %v1068_v39 = vadd.f32 %v1052_v15, %v987_v23  ;;  %v1069_v40 = vadd.f32 %v1053_v16, %v988_v24  ;;  %v1070_v41 = vadd.f32 %v1054_v17, %v989_v25 }
 0x12e   : > { %v1115_v42 = vadd.f32 %v3367_v46, %v1055_v26  ;;  %v1116_v43 = vadd.f32 %v3369_v47, %v1056_v27  ;;  %v1117_v44 = vadd.f32 %v3371_v48, %v1057_v28  ;;  %v1118_v45 = vadd.f32 %v3373_v49, %v1058_v33 }
 0x12f   : > { %v1119_v50 = vadd.f32 %v3375_v52, %v1059_v29  ;;  %v1120_v51 = vadd.f32 %v3377_v53, %v1060_v30  ;;  %v1121_v56 = vadd.f32 %v3379_v54, %v1061_v31  ;;  %v1122_v57 = vadd.f32 %v3381_v55, %v1062_v32 }
 0x130   : > { %v1123_v58 = vadd.f32 %v3367_v46, %v1063_v34  ;;  %v1124_v59 = vadd.f32 %v3369_v47, %v1064_v35  ;;  %v1125_v60 = vadd.f32 %v3371_v48, %v1065_v36  ;;  %v1126_v61 = vadd.f32 %v3373_v49, %v1066_v37 }
 0x131   : > { %v1127_v62 = vadd.f32 %v3375_v52, %v1067_v38  ;;  %v1128_v63 = vadd.f32 %v3377_v53, %v1068_v39  ;;  %v1129_v0 = vadd.f32 %v3379_v54, %v1069_v40  ;;  %v1130_v1 = vadd.f32 %v3381_v55, %v1070_v41 }
 0x132   : > { %vm1131_vm0 = vcmp.gt.f32.partialorder %v1115_v42, 0.0  ;;  %vm1132_vm1 = vcmp.gt.f32.partialorder %v1116_v43, 0.0  ;;  %vm1133_vm2 = vcmp.gt.f32.partialorder %v1117_v44, 0.0  ;;  %vm1134_vm3 = vcmp.gt.f32.partialorder %v1118_v45, 0.0 }
 0x133   : > { %vm1135_vm4 = vcmp.gt.f32.partialorder %v1119_v50, 0.0  ;;  %vm1136_vm5 = vcmp.gt.f32.partialorder %v1120_v51, 0.0  ;;  %vm1137_vm6 = vcmp.gt.f32.partialorder %v1121_v56, 0.0  ;;  %vm1138_vm7 = vcmp.gt.f32.partialorder %v1122_v57, 0.0 }
 0x134   : > { %vm1139_vm8 = vcmp.gt.f32.partialorder %v1123_v58, 0.0  ;;  %vm1140_vm9 = vcmp.gt.f32.partialorder %v1124_v59, 0.0  ;;  %vm1141_vm10 = vcmp.gt.f32.partialorder %v1125_v60, 0.0  ;;  %vm1142_vm11 = vcmp.gt.f32.partialorder %v1126_v61, 0.0 }
 0x135   : > { %vm1143_vm12 = vcmp.gt.f32.partialorder %v1127_v62, 0.0  ;;  %vm1144_vm13 = vcmp.gt.f32.partialorder %v1128_v63, 0.0  ;;  %vm1145_vm14 = vcmp.gt.f32.partialorder %v1129_v0, 0.0  ;;  %vm1146_vm15 = vcmp.gt.f32.partialorder %v1130_v1, 0.0 }
 0x136   : > { %v1147_v46 = vmul.f32 0.01, %v1115_v42  ;;  %v1148_v47 = vmul.f32 0.01, %v1116_v43  ;;  %v1149_v48 = vmul.f32 0.01, %v1117_v44 }
 0x137   : > { %v1150_v49 = vmul.f32 0.01, %v1118_v45  ;;  %v1151_v52 = vmul.f32 0.01, %v1119_v50  ;;  %v1152_v53 = vmul.f32 0.01, %v1120_v51 }
 0x138   : > { %v1153_v54 = vmul.f32 0.01, %v1121_v56  ;;  %v1154_v55 = vmul.f32 0.01, %v1122_v57  ;;  %v1155_v2 = vmul.f32 0.01, %v1123_v58  ;;  %v1163_v3 = vsel %vm1131_vm0, %v1115_v42, %v1147_v46 }
 0x139   : > { %v1156_v4 = vmul.f32 0.01, %v1124_v59  ;;  %v1157_v5 = vmul.f32 0.01, %v1125_v60  ;;  %v1158_v6 = vmul.f32 0.01, %v1126_v61  ;;  %v1164_v7 = vsel %vm1132_vm1, %v1116_v43, %v1148_v47 }
 0x13a   : > { %v1159_v8 = vmul.f32 0.01, %v1127_v62  ;;  %v1160_v9 = vmul.f32 0.01, %v1128_v63  ;;  %v1161_v10 = vmul.f32 0.01, %v1129_v0  ;;  %v1165_v11 = vsel %vm1133_vm2, %v1117_v44, %v1149_v48 }
 0x13b   : > { %v1162_v12 = vmul.f32 0.01, %v1130_v1  ;;  %v1166_v13 = vsel %vm1134_vm3, %v1118_v45, %v1150_v49  ;;  %v1167_v14 = vsel %vm1135_vm4, %v1119_v50, %v1151_v52  ;;  %v1168_v15 = vsel %vm1136_vm5, %v1120_v51, %v1152_v53 }
 0x13c   : > { %v1169_v16 = vsel %vm1137_vm6, %v1121_v56, %v1153_v54  ;;  %v1170_v17 = vsel %vm1138_vm7, %v1122_v57, %v1154_v55  ;;  %v1171_v18 = vsel %vm1139_vm8, %v1123_v58, %v1155_v2  ;;  %v1172_v19 = vsel %vm1140_vm9, %v1124_v59, %v1156_v4 }
 0x13d   : > { %v1173_v20 = vsel %vm1141_vm10, %v1125_v60, %v1157_v5  ;;  %v1174_v21 = vsel %vm1142_vm11, %v1126_v61, %v1158_v6  ;;  %v1175_v22 = vsel %vm1143_vm12, %v1127_v62, %v1159_v8  ;;  %v1176_v23 = vsel %vm1144_vm13, %v1128_v63, %v1160_v9 }
 0x13e   : > { %v1177_v24 = vsel %vm1145_vm14, %v1129_v0, %v1161_v10  ;;  %v1178_v25 = vsel %vm1146_vm15, %v1130_v1, %v1162_v12  ;;  %v1179_v26 = vpack.c.bf16 %v1171_v18, %v1163_v3  ;;  %v1180_v27 = vpack.c.bf16 %v1172_v19, %v1164_v7 }
 0x13f   : > { %v1181_v28 = vpack.c.bf16 %v1173_v20, %v1165_v11  ;;  %v1182_v33 = vpack.c.bf16 %v1174_v21, %v1166_v13  ;;  %v1183_v29 = vpack.c.bf16 %v1175_v22, %v1167_v14  ;;  %v1184_v30 = vpack.c.bf16 %v1176_v23, %v1168_v15 }
 0x140   : > { %v1185_v31 = vpack.c.bf16 %v1177_v24, %v1169_v16  ;;  %v1186_v32 = vpack.c.bf16 %v1178_v25, %v1170_v17  ;;  %1187 = vst [vmem:[#allocation2] sm:$0xff] %v1179_v26  ;;  %1188 = vst [vmem:[#allocation2 + $0x8] sm:$0xff] %v1180_v27 }
 0x141   : > { %1189 = vst [vmem:[#allocation2 + $0x10] sm:$0xff] %v1181_v28  ;;  %1190 = vst [vmem:[#allocation2 + $0x18] sm:$0xff] %v1182_v33 }
 0x142   : > { %1191 = vst [vmem:[#allocation2 + $0x20] sm:$0xff] %v1183_v29  ;;  %1192 = vst [vmem:[#allocation2 + $0x28] sm:$0xff] %v1184_v30 }
 0x143   : > { %1193 = vst [vmem:[#allocation2 + $0x30] sm:$0xff] %v1185_v31  ;;  %1194 = vst [vmem:[#allocation2 + $0x38] sm:$0xff] %v1186_v32 }
 0x144 PF: > { %v2721_v34 = vld [vmem:[%s3334_s26 + $0x4] ss:$8 sps:$4 sm:$0xff]   ;;  %v2725_v36 = vld [vmem:[%s3334_s26] ss:$8 sps:$4 sm:$0xff]   ;;  %v2727_v38 = vld [vmem:[%s3334_s26 + $0x14] ss:$8 sps:$4 sm:$0xff]  }
 0x145   : > { %v2723_v35 = vld [vmem:[%s3334_s26 + $0x204] ss:$8 sps:$4 sm:$0xff]   ;;  %1985 = vmatprep.subr.bf16.mxu1 %v2721_v34  ;;  %v2726_v37 = vld [vmem:[%s3334_s26 + $0x200] ss:$8 sps:$4 sm:$0xff]   ;;  %v2729_v39 = vld [vmem:[%s3334_s26 + $0x214] ss:$8 sps:$4 sm:$0xff]  }
 0x146   : > { %2071 = vmatprep.subr.bf16.mxu0 %v2723_v35  ;;  %1986 = vmatpush1.bf16.msra.mxu1 %v2725_v36  ;;  %v2731_v40 = vld [vmem:[%s3334_s26 + $0x10] ss:$8 sps:$4 sm:$0xff]   ;;  %v2733_v42 = vld [vmem:[%s3334_s26 + $0x24] ss:$8 sps:$4 sm:$0xff]   ;;  %v2737_v44 = vld [vmem:[%s3334_s26 + $0x20] ss:$8 sps:$4 sm:$0xff]  }
 0x147   : > { %2072 = vmatpush1.bf16.msra.mxu0 %v2726_v37  ;;  %1987 = vmatprep.subr.bf16.mxu1 %v2727_v38  ;;  %v2732_v41 = vld [vmem:[%s3334_s26 + $0x210] ss:$8 sps:$4 sm:$0xff]   ;;  %v2735_v43 = vld [vmem:[%s3334_s26 + $0x224] ss:$8 sps:$4 sm:$0xff]   ;;  %v2738_v45 = vld [vmem:[%s3334_s26 + $0x220] ss:$8 sps:$4 sm:$0xff]  }
 0x148   : > { %2073 = vmatprep.subr.bf16.mxu0 %v2729_v39  ;;  %v2739_v50 = vld [vmem:[%s3334_s26 + $0x34] ss:$8 sps:$4 sm:$0xff]   ;;  %v2743_v56 = vld [vmem:[%s3334_s26 + $0x30] ss:$8 sps:$4 sm:$0xff]   ;;  %v2745_v58 = vld [vmem:[%s3334_s26 + $0x44] ss:$8 sps:$4 sm:$0xff]  }
 0x149   : > { %v2741_v51 = vld [vmem:[%s3334_s26 + $0x234] ss:$8 sps:$4 sm:$0xff]   ;;  %v2744_v57 = vld [vmem:[%s3334_s26 + $0x230] ss:$8 sps:$4 sm:$0xff]   ;;  %v2747_v59 = vld [vmem:[%s3334_s26 + $0x244] ss:$8 sps:$4 sm:$0xff]  }
 0x14a   : > { %1988 = vmatpush1.bf16.msra.mxu1 %v2731_v40  ;;  %v2749_v60 = vld [vmem:[%s3334_s26 + $0x40] ss:$8 sps:$4 sm:$0xff]   ;;  %v2751_v62 = vld [vmem:[%s3334_s26 + $0x54] ss:$8 sps:$4 sm:$0xff]   ;;  %v2755_v0 = vld [vmem:[%s3334_s26 + $0x50] ss:$8 sps:$4 sm:$0xff]  }
 0x14b   : > { %2074 = vmatpush1.bf16.msra.mxu0 %v2732_v41  ;;  %1989 = vmatprep.subr.bf16.mxu1 %v2733_v42  ;;  %v2750_v61 = vld [vmem:[%s3334_s26 + $0x240] ss:$8 sps:$4 sm:$0xff]   ;;  %v2753_v63 = vld [vmem:[%s3334_s26 + $0x254] ss:$8 sps:$4 sm:$0xff]   ;;  %v2756_v1 = vld [vmem:[%s3334_s26 + $0x250] ss:$8 sps:$4 sm:$0xff]  }
 0x14c   : > { %2075 = vmatprep.subr.bf16.mxu0 %v2735_v43  ;;  %v2757_v46 = vld [vmem:[%s3334_s26 + $0x64] ss:$8 sps:$4 sm:$0xff]   ;;  %v2761_v48 = vld [vmem:[%s3334_s26 + $0x60] ss:$8 sps:$4 sm:$0xff]   ;;  %v2763_v52 = vld [vmem:[%s3334_s26 + $0x74] ss:$8 sps:$4 sm:$0xff]  }
 0x14d   : > { %v2759_v47 = vld [vmem:[%s3334_s26 + $0x264] ss:$8 sps:$4 sm:$0xff]   ;;  %v2762_v49 = vld [vmem:[%s3334_s26 + $0x260] ss:$8 sps:$4 sm:$0xff]   ;;  %v2765_v53 = vld [vmem:[%s3334_s26 + $0x274] ss:$8 sps:$4 sm:$0xff]  }
 0x14e   : > { %1990 = vmatpush1.bf16.msra.mxu1 %v2737_v44  ;;  %v2767_v54 = vld [vmem:[%s3334_s26 + $0x70] ss:$8 sps:$4 sm:$0xff]   ;;  %v2769_v2 = vld [vmem:[%s3334_s26 + $0x84] ss:$8 sps:$4 sm:$0xff]   ;;  %v2773_v4 = vld [vmem:[%s3334_s26 + $0x80] ss:$8 sps:$4 sm:$0xff]  }
 0x14f   : > { %2076 = vmatpush1.bf16.msra.mxu0 %v2738_v45  ;;  %1991 = vmatprep.subr.bf16.mxu1 %v2739_v50  ;;  %v2768_v55 = vld [vmem:[%s3334_s26 + $0x270] ss:$8 sps:$4 sm:$0xff]   ;;  %v2771_v3 = vld [vmem:[%s3334_s26 + $0x284] ss:$8 sps:$4 sm:$0xff]   ;;  %v2774_v5 = vld [vmem:[%s3334_s26 + $0x280] ss:$8 sps:$4 sm:$0xff]  }
 0x150   : > { %2077 = vmatprep.subr.bf16.mxu0 %v2741_v51  ;;  %v2775_v6 = vld [vmem:[%s3334_s26 + $0x94] ss:$8 sps:$4 sm:$0xff]   ;;  %v2779_v8 = vld [vmem:[%s3334_s26 + $0x90] ss:$8 sps:$4 sm:$0xff]   ;;  %v2781_v10 = vld [vmem:[%s3334_s26 + $0xa4] ss:$8 sps:$4 sm:$0xff]  }
 0x151   : > { %v2777_v7 = vld [vmem:[%s3334_s26 + $0x294] ss:$8 sps:$4 sm:$0xff]   ;;  %v2780_v9 = vld [vmem:[%s3334_s26 + $0x290] ss:$8 sps:$4 sm:$0xff]   ;;  %v2783_v11 = vld [vmem:[%s3334_s26 + $0x2a4] ss:$8 sps:$4 sm:$0xff]  }
 0x152   : > { %1992 = vmatpush1.bf16.msra.mxu1 %v2743_v56  ;;  %v2785_v12 = vld [vmem:[%s3334_s26 + $0xa0] ss:$8 sps:$4 sm:$0xff]   ;;  %v2787_v14 = vld [vmem:[%s3334_s26 + $0xb4] ss:$8 sps:$4 sm:$0xff]   ;;  %v2791_v17 = vld [vmem:[%s3334_s26 + $0xb0] ss:$8 sps:$4 sm:$0xff]  }
 0x153   : > { %2078 = vmatpush1.bf16.msra.mxu0 %v2744_v57  ;;  %1993 = vmatprep.subr.bf16.mxu1 %v2745_v58  ;;  %v2786_v13 = vld [vmem:[%s3334_s26 + $0x2a0] ss:$8 sps:$4 sm:$0xff]   ;;  %v2789_v15 = vld [vmem:[%s3334_s26 + $0x2b4] ss:$8 sps:$4 sm:$0xff]   ;;  %v2792_v18 = vld [vmem:[%s3334_s26 + $0x2b0] ss:$8 sps:$4 sm:$0xff]  }
 0x154   : > { %2079 = vmatprep.subr.bf16.mxu0 %v2747_v59  ;;  %v1198_v16 = vld [vmem:[#allocation2 + $0x8] sm:$0xff]  ;;  %v2793_v20 = vld [vmem:[%s3334_s26 + $0xc4] ss:$8 sps:$4 sm:$0xff]   ;;  %v2797_v22 = vld [vmem:[%s3334_s26 + $0xc0] ss:$8 sps:$4 sm:$0xff]   ;;  %p2630_p12 = scmp.ne.s32.totalorder %s2959_s28, 3 }
 0x155   : > { %2017 = vmatprep.mubr.bf16.mxu1 %v1198_v16  ;;  %v1202_v19 = vld [vmem:[#allocation2 + $0x28] sm:$0xff]  ;;  %v2795_v21 = vld [vmem:[%s3334_s26 + $0x2c4] ss:$8 sps:$4 sm:$0xff]   ;;  %v2798_v23 = vld [vmem:[%s3334_s26 + $0x2c0] ss:$8 sps:$4 sm:$0xff]  }
 0x156   : > { %1994 = vmatpush1.bf16.msra.mxu1 %v2749_v60  ;;  %2103 = vmatprep.mubr.bf16.mxu0 %v1202_v19  ;;  %v2799_v24 = vld [vmem:[%s3334_s26 + $0xd4] ss:$8 sps:$4 sm:$0xff]   ;;  %v2803_v26 = vld [vmem:[%s3334_s26 + $0xd0] ss:$8 sps:$4 sm:$0xff]   ;;  %v2805_v28 = vld [vmem:[%s3334_s26 + $0xe4] ss:$8 sps:$4 sm:$0xff]  }
 0x157   : > { %2080 = vmatpush1.bf16.msra.mxu0 %v2750_v61  ;;  %1995 = vmatprep.subr.bf16.mxu1 %v2751_v62  ;;  %v2801_v25 = vld [vmem:[%s3334_s26 + $0x2d4] ss:$8 sps:$4 sm:$0xff]   ;;  %v2804_v27 = vld [vmem:[%s3334_s26 + $0x2d0] ss:$8 sps:$4 sm:$0xff]   ;;  %v2807_v33 = vld [vmem:[%s3334_s26 + $0x2e4] ss:$8 sps:$4 sm:$0xff]  }
 0x158   : > { %2081 = vmatprep.subr.bf16.mxu0 %v2753_v63  ;;  %v2809_v29 = vld [vmem:[%s3334_s26 + $0xe0] ss:$8 sps:$4 sm:$0xff]   ;;  %v2811_v31 = vld [vmem:[%s3334_s26 + $0xf4] ss:$8 sps:$4 sm:$0xff]   ;;  %v2815_v34 = vld [vmem:[%s3334_s26 + $0xf0] ss:$8 sps:$4 sm:$0xff]  }
 0x159   : > { %v2810_v30 = vld [vmem:[%s3334_s26 + $0x2e0] ss:$8 sps:$4 sm:$0xff]   ;;  %v2813_v32 = vld [vmem:[%s3334_s26 + $0x2f4] ss:$8 sps:$4 sm:$0xff]   ;;  %v2816_v35 = vld [vmem:[%s3334_s26 + $0x2f0] ss:$8 sps:$4 sm:$0xff]  }
 0x15a   : > { %1996 = vmatpush1.bf16.msra.mxu1 %v2755_v0  ;;  %v2819_v36 = vld [vmem:[%s3334_s26 + $0x104] ss:$8 sps:$4 sm:$0xff]   ;;  %v2817_v38 = vld [vmem:[%s3334_s26 + $0x100] ss:$8 sps:$4 sm:$0xff]   ;;  %v1197_v40 = vld [vmem:[#allocation2] sm:$0xff] }
 0x15b   : > { %2082 = vmatpush1.bf16.msra.mxu0 %v2756_v1  ;;  %1997 = vmatprep.subr.bf16.mxu1 %v2757_v46  ;;  %v2822_v37 = vld [vmem:[%s3334_s26 + $0x304] ss:$8 sps:$4 sm:$0xff]   ;;  %v2820_v39 = vld [vmem:[%s3334_s26 + $0x300] ss:$8 sps:$4 sm:$0xff]   ;;  %v1201_v41 = vld [vmem:[#allocation2 + $0x20] sm:$0xff] }
 0x15c   : > { %2083 = vmatprep.subr.bf16.mxu0 %v2759_v47  ;;  %v2825_v42 = vld [vmem:[%s3334_s26 + $0x114] ss:$8 sps:$4 sm:$0xff]   ;;  %v2823_v44 = vld [vmem:[%s3334_s26 + $0x110] ss:$8 sps:$4 sm:$0xff]   ;;  %v2831_v50 = vld [vmem:[%s3334_s26 + $0x124] ss:$8 sps:$4 sm:$0xff]  }
 0x15d   : > { %v2828_v43 = vld [vmem:[%s3334_s26 + $0x314] ss:$8 sps:$4 sm:$0xff]   ;;  %v2826_v45 = vld [vmem:[%s3334_s26 + $0x310] ss:$8 sps:$4 sm:$0xff]   ;;  %v2834_v51 = vld [vmem:[%s3334_s26 + $0x324] ss:$8 sps:$4 sm:$0xff]  }
 0x15e   : > { %1998 = vmatpush1.bf16.msra.mxu1 %v2761_v48  ;;  %v2829_v56 = vld [vmem:[%s3334_s26 + $0x120] ss:$8 sps:$4 sm:$0xff]   ;;  %v2837_v58 = vld [vmem:[%s3334_s26 + $0x134] ss:$8 sps:$4 sm:$0xff]   ;;  %v2835_v60 = vld [vmem:[%s3334_s26 + $0x130] ss:$8 sps:$4 sm:$0xff]  }
 0x15f   : > { %2084 = vmatpush1.bf16.msra.mxu0 %v2762_v49  ;;  %1999 = vmatprep.subr.bf16.mxu1 %v2763_v52  ;;  %v2832_v57 = vld [vmem:[%s3334_s26 + $0x320] ss:$8 sps:$4 sm:$0xff]   ;;  %v2840_v59 = vld [vmem:[%s3334_s26 + $0x334] ss:$8 sps:$4 sm:$0xff]   ;;  %v2838_v61 = vld [vmem:[%s3334_s26 + $0x330] ss:$8 sps:$4 sm:$0xff]  }
 0x160   : > { %2085 = vmatprep.subr.bf16.mxu0 %v2765_v53  ;;  %v2843_v62 = vld [vmem:[%s3334_s26 + $0x144] ss:$8 sps:$4 sm:$0xff]   ;;  %v2841_v0 = vld [vmem:[%s3334_s26 + $0x140] ss:$8 sps:$4 sm:$0xff]   ;;  %v2849_v46 = vld [vmem:[%s3334_s26 + $0x154] ss:$8 sps:$4 sm:$0xff]  }
 0x161   : > { %v2846_v63 = vld [vmem:[%s3334_s26 + $0x344] ss:$8 sps:$4 sm:$0xff]   ;;  %v2844_v1 = vld [vmem:[%s3334_s26 + $0x340] ss:$8 sps:$4 sm:$0xff]   ;;  %v2852_v47 = vld [vmem:[%s3334_s26 + $0x354] ss:$8 sps:$4 sm:$0xff]  }
 0x162   : > { %2000 = vmatpush1.bf16.msra.mxu1 %v2767_v54  ;;  %v2847_v48 = vld [vmem:[%s3334_s26 + $0x150] ss:$8 sps:$4 sm:$0xff]   ;;  %v2855_v52 = vld [vmem:[%s3334_s26 + $0x164] ss:$8 sps:$4 sm:$0xff]   ;;  %v2880_v19 = vld [vmem:[%s3334_s26 + $0x3a0] ss:$8 sps:$4 sm:$0xff]  }
 0x163   : > { %2086 = vmatpush1.bf16.msra.mxu0 %v2768_v55  ;;  %2001 = vmatprep.subr.bf16.mxu1 %v2769_v2  ;;  %v2850_v49 = vld [vmem:[%s3334_s26 + $0x350] ss:$8 sps:$4 sm:$0xff]   ;;  %v2858_v53 = vld [vmem:[%s3334_s26 + $0x364] ss:$8 sps:$4 sm:$0xff]   ;;  %v2853_v55 = vld [vmem:[%s3334_s26 + $0x160] ss:$8 sps:$4 sm:$0xff]  }
 0x164   : > { %2087 = vmatprep.subr.bf16.mxu0 %v2771_v3  ;;  %v1200_v54 = vld [vmem:[#allocation2 + $0x18] sm:$0xff] }
 0x165   : > { %v2856_v2 = vld [vmem:[%s3334_s26 + $0x360] ss:$8 sps:$4 sm:$0xff]   ;;  %v2879_v16 = vld [vmem:[%s3334_s26 + $0x1a4] ss:$8 sps:$4 sm:$0xff]  }
 0x166   : > { %2002 = vmatpush1.bf16.msra.mxu1 %v2773_v4  ;;  %v1204_v3 = vld [vmem:[#allocation2 + $0x38] sm:$0xff]  ;;  %v2861_v4 = vld [vmem:[%s3334_s26 + $0x174] ss:$8 sps:$4 sm:$0xff]  }
 0x167   : > { %2088 = vmatpush1.bf16.msra.mxu0 %v2774_v5  ;;  %2003 = vmatprep.subr.bf16.mxu1 %v2775_v6  ;;  %v2864_v5 = vld [vmem:[%s3334_s26 + $0x374] ss:$8 sps:$4 sm:$0xff]   ;;  %v2859_v6 = vld [vmem:[%s3334_s26 + $0x170] ss:$8 sps:$4 sm:$0xff]  }
 0x168   : > { %2089 = vmatprep.subr.bf16.mxu0 %v2777_v7  ;;  %v2862_v7 = vld [vmem:[%s3334_s26 + $0x370] ss:$8 sps:$4 sm:$0xff]  }
 0x16a   : > { %2004 = vmatpush1.bf16.msra.mxu1 %v2779_v8  ;;  %v2867_v8 = vld [vmem:[%s3334_s26 + $0x184] ss:$8 sps:$4 sm:$0xff]  }
 0x16b   : > { %2090 = vmatpush1.bf16.msra.mxu0 %v2780_v9  ;;  %2005 = vmatprep.subr.bf16.mxu1 %v2781_v10  ;;  %v2870_v9 = vld [vmem:[%s3334_s26 + $0x384] ss:$8 sps:$4 sm:$0xff]   ;;  %v2865_v10 = vld [vmem:[%s3334_s26 + $0x180] ss:$8 sps:$4 sm:$0xff]  }
 0x16c   : > { %2091 = vmatprep.subr.bf16.mxu0 %v2783_v11  ;;  %v2868_v11 = vld [vmem:[%s3334_s26 + $0x380] ss:$8 sps:$4 sm:$0xff]  }
 0x16e   : > { %2006 = vmatpush1.bf16.msra.mxu1 %v2785_v12  ;;  %v2873_v12 = vld [vmem:[%s3334_s26 + $0x194] ss:$8 sps:$4 sm:$0xff]  }
 0x16f   : > { %2092 = vmatpush1.bf16.msra.mxu0 %v2786_v13  ;;  %2007 = vmatprep.subr.bf16.mxu1 %v2787_v14  ;;  %v2876_v13 = vld [vmem:[%s3334_s26 + $0x394] ss:$8 sps:$4 sm:$0xff]   ;;  %v2871_v14 = vld [vmem:[%s3334_s26 + $0x190] ss:$8 sps:$4 sm:$0xff]  }
 0x170   : > { %2093 = vmatprep.subr.bf16.mxu0 %v2789_v15  ;;  %v2874_v15 = vld [vmem:[%s3334_s26 + $0x390] ss:$8 sps:$4 sm:$0xff]  }
 0x172   : > { %2008 = vmatpush1.bf16.msra.mxu1 %v2791_v17  ;;  %v2882_v17 = vld [vmem:[%s3334_s26 + $0x3a4] ss:$8 sps:$4 sm:$0xff]  }
 0x173   : > { %2094 = vmatpush1.bf16.msra.mxu0 %v2792_v18  ;;  %2009 = vmatprep.subr.bf16.mxu1 %v2793_v20  ;;  %v2877_v18 = vld [vmem:[%s3334_s26 + $0x1a0] ss:$8 sps:$4 sm:$0xff]   ;;  %v2885_v20 = vld [vmem:[%s3334_s26 + $0x1b4] ss:$8 sps:$4 sm:$0xff]  }
 0x174   : > { %2095 = vmatprep.subr.bf16.mxu0 %v2795_v21  ;;  %v2888_v21 = vld [vmem:[%s3334_s26 + $0x3b4] ss:$8 sps:$4 sm:$0xff]  }
 0x176   : > { %2010 = vmatpush1.bf16.msra.mxu1 %v2797_v22  ;;  %v2883_v22 = vld [vmem:[%s3334_s26 + $0x1b0] ss:$8 sps:$4 sm:$0xff]  }
 0x177   : > { %2096 = vmatpush1.bf16.msra.mxu0 %v2798_v23  ;;  %2011 = vmatprep.subr.bf16.mxu1 %v2799_v24  ;;  %v2886_v23 = vld [vmem:[%s3334_s26 + $0x3b0] ss:$8 sps:$4 sm:$0xff]   ;;  %v2891_v24 = vld [vmem:[%s3334_s26 + $0x1c4] ss:$8 sps:$4 sm:$0xff]  }
 0x178   : > { %2097 = vmatprep.subr.bf16.mxu0 %v2801_v25  ;;  %v2894_v25 = vld [vmem:[%s3334_s26 + $0x3c4] ss:$8 sps:$4 sm:$0xff]  }
 0x17a   : > { %2012 = vmatpush1.bf16.msra.mxu1 %v2803_v26  ;;  %v2889_v26 = vld [vmem:[%s3334_s26 + $0x1c0] ss:$8 sps:$4 sm:$0xff]  }
 0x17b   : > { %2098 = vmatpush1.bf16.msra.mxu0 %v2804_v27  ;;  %2013 = vmatprep.subr.bf16.mxu1 %v2805_v28  ;;  %v2892_v27 = vld [vmem:[%s3334_s26 + $0x3c0] ss:$8 sps:$4 sm:$0xff]   ;;  %v2897_v28 = vld [vmem:[%s3334_s26 + $0x1d4] ss:$8 sps:$4 sm:$0xff]  }
 0x17c   : > { %2099 = vmatprep.subr.bf16.mxu0 %v2807_v33  ;;  %v2900_v33 = vld [vmem:[%s3334_s26 + $0x3d4] ss:$8 sps:$4 sm:$0xff]  }
 0x17e   : > { %2014 = vmatpush1.bf16.msra.mxu1 %v2809_v29  ;;  %v2895_v29 = vld [vmem:[%s3334_s26 + $0x1d0] ss:$8 sps:$4 sm:$0xff]  }
 0x17f   : > { %2100 = vmatpush1.bf16.msra.mxu0 %v2810_v30  ;;  %2015 = vmatprep.subr.bf16.mxu1 %v2811_v31  ;;  %v2898_v30 = vld [vmem:[%s3334_s26 + $0x3d0] ss:$8 sps:$4 sm:$0xff]   ;;  %v2903_v31 = vld [vmem:[%s3334_s26 + $0x1e4] ss:$8 sps:$4 sm:$0xff]  }
 0x180   : > { %2101 = vmatprep.subr.bf16.mxu0 %v2813_v32  ;;  %v2906_v32 = vld [vmem:[%s3334_s26 + $0x3e4] ss:$8 sps:$4 sm:$0xff]  }
 0x182   : > { %2016 = vmatpush1.bf16.msra.mxu1 %v2815_v34  ;;  %v2901_v34 = vld [vmem:[%s3334_s26 + $0x1e0] ss:$8 sps:$4 sm:$0xff]  }
 0x183   : > { %2102 = vmatpush1.bf16.msra.mxu0 %v2816_v35  ;;  %2028 = vmatprep.subr.bf16.mxu1 %v2819_v36  ;;  %v2904_v35 = vld [vmem:[%s3334_s26 + $0x3e0] ss:$8 sps:$4 sm:$0xff]   ;;  %v2909_v36 = vld [vmem:[%s3334_s26 + $0x1f4] ss:$8 sps:$4 sm:$0xff]  }
 0x184   : > { %2114 = vmatprep.subr.bf16.mxu0 %v2822_v37  ;;  %v2912_v37 = vld [vmem:[%s3334_s26 + $0x3f4] ss:$8 sps:$4 sm:$0xff]  }
 0x185   : > { %2018 = vmatmul.mubr.bf16.vlgmr.msra.gmra.mrb[0].mxu1 %v1197_v40  ;;  %v2913_v40 = vld [vmem:[%s3332_s11 + $0x40] sm:$0xff]  }
 0x186   : > { %2104 = vmatmul.mubr.bf16.vlgmr.msra.gmra.mrb[0].mxu0 %v1201_v41  ;;  %2029 = vmatpush1.bf16.msra.mxu1 %v2817_v38  ;;  %v2907_v38 = vld [vmem:[%s3334_s26 + $0x1f0] ss:$8 sps:$4 sm:$0xff]   ;;  %v1199_v41 = vld [vmem:[#allocation2 + $0x10] sm:$0xff] }
 0x187   : > { %2115 = vmatpush1.bf16.msra.mxu0 %v2820_v39  ;;  %2030 = vmatprep.subr.bf16.mxu1 %v2825_v42  ;;  %v2910_v39 = vld [vmem:[%s3334_s26 + $0x3f0] ss:$8 sps:$4 sm:$0xff]   ;;  %v1203_v42 = vld [vmem:[#allocation2 + $0x30] sm:$0xff] }
 0x188   : > { %2116 = vmatprep.subr.bf16.mxu0 %v2828_v43  ;;  %2060 = vmatprep.mubr.bf16.mxu1 %v1200_v54  ;;  %v2914_v43 = vld [vmem:[%s3332_s11] sm:$0xff]  }
 0x189   : > { %2146 = vmatprep.mubr.bf16.mxu0 %v1204_v3 }
 0x18a   : > { %2031 = vmatpush1.bf16.msra.mxu1 %v2823_v44  ;;  %v2915_v44 = vld [vmem:[%s3332_s11 + $0x48] sm:$0xff]  }
 0x18b   : > { %2117 = vmatpush1.bf16.msra.mxu0 %v2826_v45  ;;  %2032 = vmatprep.subr.bf16.mxu1 %v2831_v50  ;;  %v2916_v45 = vld [vmem:[%s3332_s11 + $0x8] sm:$0xff]   ;;  %v2917_v50 = vld [vmem:[%s3332_s11 + $0x50] sm:$0xff]  }
 0x18c   : > { %2118 = vmatprep.subr.bf16.mxu0 %v2834_v51  ;;  %v2918_v51 = vld [vmem:[%s3332_s11 + $0x10] sm:$0xff]  }
 0x18e   : > { %2033 = vmatpush1.bf16.msra.mxu1 %v2829_v56  ;;  %v2919_v56 = vld [vmem:[%s3332_s11 + $0x58] sm:$0xff]  }
 0x18f   : > { %2119 = vmatpush1.bf16.msra.mxu0 %v2832_v57  ;;  %2034 = vmatprep.subr.bf16.mxu1 %v2837_v58  ;;  %v2920_v57 = vld [vmem:[%s3332_s11 + $0x18] sm:$0xff]   ;;  %v2921_v58 = vld [vmem:[%s3332_s11 + $0x60] sm:$0xff]  }
 0x190   : > { %2120 = vmatprep.subr.bf16.mxu0 %v2840_v59  ;;  %v2922_v59 = vld [vmem:[%s3332_s11 + $0x20] sm:$0xff]  }
 0x192   : > { %2035 = vmatpush1.bf16.msra.mxu1 %v2835_v60  ;;  %v2923_v60 = vld [vmem:[%s3332_s11 + $0x68] sm:$0xff]  }
 0x193   : > { %2121 = vmatpush1.bf16.msra.mxu0 %v2838_v61  ;;  %2036 = vmatprep.subr.bf16.mxu1 %v2843_v62  ;;  %v2924_v61 = vld [vmem:[%s3332_s11 + $0x28] sm:$0xff]   ;;  %v2925_v62 = vld [vmem:[%s3332_s11 + $0x70] sm:$0xff]  }
 0x194   : > { %2122 = vmatprep.subr.bf16.mxu0 %v2846_v63  ;;  %v2926_v63 = vld [vmem:[%s3332_s11 + $0x30] sm:$0xff]  }
 0x196   : > { %2037 = vmatpush1.bf16.msra.mxu1 %v2841_v0  ;;  %v2927_v0 = vld [vmem:[%s3332_s11 + $0x78] sm:$0xff]  }
 0x197   : > { %2123 = vmatpush1.bf16.msra.mxu0 %v2844_v1  ;;  %2038 = vmatprep.subr.bf16.mxu1 %v2849_v46  ;;  %v2928_v1 = vld [vmem:[%s3332_s11 + $0x38] sm:$0xff]   ;;  %v1335_v46 = vlaneseq }
 0x198   : > { %2124 = vmatprep.subr.bf16.mxu0 %v2852_v47 }
 0x199   : > { %v1336_v47 = vshrl.u32 %v1335_v46, 7 }
 0x19a   : > { %2039 = vmatpush1.bf16.msra.mxu1 %v2847_v48 }
 0x19b   : > { %2125 = vmatpush1.bf16.msra.mxu0 %v2850_v49  ;;  %2040 = vmatprep.subr.bf16.mxu1 %v2855_v52  ;;  %v1337_v48 = vsub.s32 0, %v1336_v47  ;;  %v1333_v49 = vld [vmem:[%s886_s24] sm:$0x3]  ;;  %v1341_v52 = vsub.s32 1, %v1336_v47 }
 0x19c   : > { %2126 = vmatprep.subr.bf16.mxu0 %v2858_v53 }
 0x19d   : > { %v1338_v53 = vrot.slane %v1333_v49, %v1337_v48  ;;  %v1342_v54 = vrot.slane %v1333_v49, %v1341_v52 }
 0x19e   : > { %2041 = vmatpush1.bf16.msra.mxu1 %v2853_v55 }
 0x19f   : > { %2127 = vmatpush1.bf16.msra.mxu0 %v2856_v2  ;;  %2042 = vmatprep.subr.bf16.mxu1 %v2861_v4 }
 0x1a0   : > { %2128 = vmatprep.subr.bf16.mxu0 %v2864_v5 }
 0x1a2   : > { %2043 = vmatpush1.bf16.msra.mxu1 %v2859_v6 }
 0x1a3   : > { %2129 = vmatpush1.bf16.msra.mxu0 %v2862_v7  ;;  %2044 = vmatprep.subr.bf16.mxu1 %v2867_v8 }
 0x1a4   : > { %2130 = vmatprep.subr.bf16.mxu0 %v2870_v9 }
 0x1a6   : > { %2045 = vmatpush1.bf16.msra.mxu1 %v2865_v10 }
 0x1a7   : > { %2131 = vmatpush1.bf16.msra.mxu0 %v2868_v11  ;;  %2046 = vmatprep.subr.bf16.mxu1 %v2873_v12 }
 0x1a8   : > { %2132 = vmatprep.subr.bf16.mxu0 %v2876_v13 }
 0x1aa   : > { %2047 = vmatpush1.bf16.msra.mxu1 %v2871_v14 }
 0x1ab   : > { %2133 = vmatpush1.bf16.msra.mxu0 %v2874_v15  ;;  %2048 = vmatprep.subr.bf16.mxu1 %v2879_v16 }
 0x1ac   : > { %2134 = vmatprep.subr.bf16.mxu0 %v2882_v17 }
 0x1ae   : > { %2049 = vmatpush1.bf16.msra.mxu1 %v2877_v18 }
 0x1af   : > { %2135 = vmatpush1.bf16.msra.mxu0 %v2880_v19  ;;  %2050 = vmatprep.subr.bf16.mxu1 %v2885_v20 }
 0x1b0   : > { %2136 = vmatprep.subr.bf16.mxu0 %v2888_v21 }
 0x1b2   : > { %2051 = vmatpush1.bf16.msra.mxu1 %v2883_v22 }
 0x1b3   : > { %2137 = vmatpush1.bf16.msra.mxu0 %v2886_v23  ;;  %2052 = vmatprep.subr.bf16.mxu1 %v2891_v24 }
 0x1b4   : > { %2138 = vmatprep.subr.bf16.mxu0 %v2894_v25 }
 0x1b6   : > { %2053 = vmatpush1.bf16.msra.mxu1 %v2889_v26 }
 0x1b7   : > { %2139 = vmatpush1.bf16.msra.mxu0 %v2892_v27  ;;  %2054 = vmatprep.subr.bf16.mxu1 %v2897_v28  ;;  %v2169_v28 = vld [vmem:[#allocation3] sm:$0xff] }
 0x1b8   : > { %2140 = vmatprep.subr.bf16.mxu0 %v2900_v33 }
 0x1ba   : > { %2055 = vmatpush1.bf16.msra.mxu1 %v2895_v29 }
 0x1bb   : > { %2141 = vmatpush1.bf16.msra.mxu0 %v2898_v30  ;;  %2056 = vmatprep.subr.bf16.mxu1 %v2903_v31  ;;  %v2170_v31 = vld [vmem:[#allocation3 + $0x8] sm:$0xff] }
 0x1bc   : > { %2142 = vmatprep.subr.bf16.mxu0 %v2906_v32 }
 0x1be   : > { %2057 = vmatpush1.bf16.msra.mxu1 %v2901_v34 }
 0x1bf   : > { %2143 = vmatpush1.bf16.msra.mxu0 %v2904_v35  ;;  %2058 = vmatprep.subr.bf16.mxu1 %v2909_v36 }
 0x1c0   : > { %2144 = vmatprep.subr.bf16.mxu0 %v2912_v37 }
 0x1c2   : > { %2059 = vmatpush1.bf16.msra.mxu1 %v2907_v38  ;;  %v2631_v38 = vld [vmem:[%s3595_s6] ss:$0 sm:$0xff] (!%p2630_p12) }
 0x1c3   : > { %2145 = vmatpush1.bf16.msra.mxu0 %v2910_v39  ;;  %2637 = vmatprep.subr.bf16.mxu1 %v2913_v40 }
 0x1c5   : > { %2061 = vmatmul.mubr.bf16.vlgmr.msra.gmra.mrb[0].mxu1 %v1199_v41 }
 0x1c6   : > { %2147 = vmatmul.mubr.bf16.vlgmr.msra.gmra.mrb[0].mxu0 %v1203_v42  ;;  %2638 = vmatpush3.bf16.msra.mxu1 %v2914_v43 }
 0x1c7   : > { %2639 = vmatprep.subr.bf16.mxu1 %v2915_v44 }
 0x1ca   : > { %2640 = vmatpush3.bf16.msra.mxu1 %v2916_v45 }
 0x1cb   : > { %2641 = vmatprep.subr.bf16.mxu1 %v2917_v50 }
 0x1ce   : > { %2642 = vmatpush3.bf16.msra.mxu1 %v2918_v51 }
 0x1cf   : > { %2643 = vmatprep.subr.bf16.mxu1 %v2919_v56 }
 0x1d2   : > { %2644 = vmatpush3.bf16.msra.mxu1 %v2920_v57 }
 0x1d3   : > { %2645 = vmatprep.subr.bf16.mxu1 %v2921_v58 }
 0x1d6   : > { %2646 = vmatpush3.bf16.msra.mxu1 %v2922_v59 }
 0x1d7   : > { %2647 = vmatprep.subr.bf16.mxu1 %v2923_v60 }
 0x1da   : > { %2648 = vmatpush3.bf16.msra.mxu1 %v2924_v61 }
 0x1db   : > { %2649 = vmatprep.subr.bf16.mxu1 %v2925_v62 }
 0x1de   : > { %2650 = vmatpush3.bf16.msra.mxu1 %v2926_v63 }
 0x1df   : > { %2651 = vmatprep.subr.bf16.mxu1 %v2927_v0 }
 0x1e2   : > { %2652 = vmatpush3.bf16.msra.mxu1 %v2928_v1 }
 0x298   : > { %v2062_v55 = vpop.f32.mrb[0].mxu1 }
 0x299   : > { %v2148_v2 = vpop.f32.mrb[0].mxu0  ;;  %v2659_v3 = vadd.f32 %v2062_v55, %v1338_v53  ;;  %v2064_v4 = vpop.f32.mrb[1].mxu1 }
 0x29a   : > { %v2150_v5 = vpop.f32.mrb[1].mxu0  ;;  %v2661_v6 = vadd.f32 %v2064_v4, %v1342_v54  ;;  %v2066_v7 = vpop.f32.mrb[2].mxu1 }
 0x29b   : > { %v2152_v8 = vpop.f32.mrb[2].mxu0  ;;  %v2660_v9 = vadd.f32 %v2659_v3, %v2148_v2  ;;  %v2663_v10 = vadd.f32 %v2066_v7, %v1338_v53  ;;  %v2068_v11 = vpop.f32.mrb[3].mxu1 }
 0x29c   : > { %v2154_v12 = vpop.f32.mrb[3].mxu0  ;;  %v2662_v13 = vadd.f32 %v2661_v6, %v2150_v5  ;;  %v2665_v14 = vadd.f32 %v2068_v11, %v1342_v54 }
 0x29d   : > { %v2161_v15 = vmul.f32 0.01, %v2660_v9  ;;  %v2664_v16 = vadd.f32 %v2663_v10, %v2152_v8  ;;  %vm2157_vm0 = vcmp.gt.f32.partialorder %v2660_v9, 0.0 }
 0x29e   : > { %v2162_v17 = vmul.f32 0.01, %v2662_v13  ;;  %v2666_v18 = vadd.f32 %v2665_v14, %v2154_v12  ;;  %vm2158_vm1 = vcmp.gt.f32.partialorder %v2662_v13, 0.0 }
 0x29f   : > { %vm2159_vm2 = vcmp.gt.f32.partialorder %v2664_v16, 0.0  ;;  %v2163_v19 = vmul.f32 0.01, %v2664_v16  ;;  %v2165_v21 = vsel %vm2157_vm0, %v2660_v9, %v2161_v15 }
 0x2a0   : > { %vm2160_vm3 = vcmp.gt.f32.partialorder %v2666_v18, 0.0  ;;  %v2164_v20 = vmul.f32 0.01, %v2666_v18  ;;  %v2166_v24 = vsel %vm2158_vm1, %v2662_v13, %v2162_v17 }
 0x2a1   : > { %v2167_v22 = vsel %vm2159_vm2, %v2664_v16, %v2163_v19 }
 0x2a2   : > { %v2171_v23 = vpack.c.bf16 %v2167_v22, %v2165_v21  ;;  %v2168_v25 = vsel %vm2160_vm3, %v2666_v18, %v2164_v20 }
 0x2a3   : > { %v2172_v26 = vpack.c.bf16 %v2168_v25, %v2166_v24 }
 0x2a5   : > { %2333 = vmatprep.mubr.bf16.mxu1 %v2172_v26 }
 0x2a6   : > { %2334 = vmatmul.mubr.bf16.vlgmr.msra.gmra.mrb[4].mxu1 %v2171_v23 }
 0x379   : > { %v2653_v27 = vpop.f32.mrb[4].mxu1 }
 0x37a   : > { %v2654_v33 = vpop.f32.mrb[5].mxu1 }
 0x37b   : > { %v2655_v29 = vadd.f32 %v2654_v33, %v2653_v27  ;;  %v2656_v30 = vpop.f32.mrb[6].mxu1  ;;  %2349 = sbr.rel (%p2630_p12) target bundleno = 908 (0x38c), region = 94 }
 0x37c   : > { %v2657_v32 = vpop.f32.mrb[7].mxu1 }
 0x37d   : > { %v2342_v34 = vadd.f32 %v2655_v29, %v2169_v28  ;;  %v2658_v35 = vadd.f32 %v2657_v32, %v2656_v30 }
 0x37f   : > { %2344 = vst [vmem:[#allocation3] sm:$0xff] %v2342_v34  ;;  %v2343_v36 = vadd.f32 %v2658_v35, %v2170_v31 }
 0x381   : > { %2345 = vst [vmem:[#allocation3 + $0x8] sm:$0xff] %v2343_v36 }
 0x386   : > { %v2350_v37 = vld [vmem:[#allocation3] sm:$0xff] }
 0x387   : > { %v2359_v40 = vadd.f32 %v2631_v38, %v2350_v37 }
 0x388   : > { %v2351_v39 = vld [vmem:[#allocation3 + $0x8] sm:$0xff] }
 0x389   : > { %v2360_v41 = vadd.f32 %v2631_v38, %v2351_v39  ;;  %2361 = vst [vmem:[%s3596_s7] sm:$0xff] %v2359_v40 }
 0x38b   : > { %2362 = vst [vmem:[%s3596_s7 + $0x8] sm:$0xff] %v2360_v41 }
 0x38c PF: > { %s18_s30 = sadd.s32 1, %s2967_s30   ;;  %s3597_s26 = smov %s2955_s27 }
 0x38d   : > { %p15_p13 = scmp.ge.s32.totalorder %s18_s30, 6   ;;  %s3598_s27 = smov %s3050_s10 }
 0x38e   : > { %s3599_s28 = smov %s2963_s29  ;;  %s3600_s29 = smov %s3602_s0 }
 0x38f   :  { %17 = sbr.rel (!%p15_p13) target bundleno = 5 (0x5), region = 141 }

</bundles_post_ra>
